<compile_context>
chip_gen: v7x
topology: tpu7x:2x2x1
jax: 0.10.0
libtpu: 0.0.40
codegen_flags: <defaults>
</compile_context>

<pallas_src>
import functools

import jax
import jax.numpy as jnp
from jax.experimental import pallas as pl
from jax.experimental.pallas import tpu as pltpu

# --- model hyper-parameters (small, consistent with the module's forward) ---
VOCAB_SIZE = 64
EMBEDDING_DIM = 32
HIDDEN_DIM = 32
N_LAYERS = 2
OUTPUT_SIZE = 1
BATCH = 8
SEQ_LEN = 8


def _make_sentiment_kernel(T: int, B: int, H: int, zero_init: bool):
    """Build the fused 2-layer LSTM + fc + sigmoid kernel.

    Inputs (all VMEM, whole-array blocks):
      x_ref   : (T*B, 4H)  layer-0 input projection, time-major rows, bias b0 pre-folded
      w_ref   : (H, 12H)   packed [W_ih1 | W_hh0 | W_hh1]  (lane-128-aligned slices)
      aux_ref : (2, 4H)    row 0 = b_ih1 + b_hh1 ; row 1 = [fc_w (H) | fc_b | 0...]
      h0_ref, c0_ref : (L, B, H)  (absent when zero_init)
    Outputs: sig (B,1), h_n (L,B,H), c_n (L,B,H).
    """
    H4 = 4 * H

    def cell(gates, c, zero_c):
        # 2 EUP pushes for all 4 gates; PyTorch gate order i, f, g, o.
        # TODO(synk): if the bundle dump shows relayout copies for the 32-lane gate slices,
        # realign with pltpu.roll (XLU slot) or reorder gate columns host-side.
        sig_all = jax.nn.sigmoid(gates)
        tanh_all = jnp.tanh(gates)
        i = sig_all[:, 0 * H:1 * H]
        f = sig_all[:, 1 * H:2 * H]
        g = tanh_all[:, 2 * H:3 * H]
        o = sig_all[:, 3 * H:4 * H]
        c_new = (i * g) if zero_c else (f * c + i * g)
        h_new = o * jnp.tanh(c_new)
        return h_new, c_new

    def body(x_ref, w_ref, aux_ref, h0_ref, c0_ref, sig_ref, hn_ref, cn_ref):
        # Packed recurrent weights: one DMA, sliced at lane-128 boundaries.
        w_l0out = w_ref[:, 0:8 * H]          # [W_ih1 | W_hh0] : h_l0 @ this -> [g1_in | g0_next]
        w_ih1 = w_ref[:, 0:4 * H]            # layer-1 input weights only (used on last step)
        w_hh0 = w_ref[:, 4 * H:8 * H]        # layer-0 recurrent weights (general step 0 only)
        w_hh1 = w_ref[:, 8 * H:12 * H]       # layer-1 recurrent weights
        # Hoist the layer-1 bias broadcast out of the loop.
        b1 = jnp.broadcast_to(aux_ref[0:1, :], (B, H4))

        if zero_init:
            h_l1 = jnp.zeros((B, H), jnp.float32)
            c_l0 = jnp.zeros((B, H), jnp.float32)
            c_l1 = jnp.zeros((B, H), jnp.float32)
            h_l0_prev = None
        else:
            h_l0_prev = h0_ref[0]
            h_l1 = h0_ref[1]
            c_l0 = c0_ref[0]
            c_l1 = c0_ref[1]

        h_l0 = None
        a_next = None   # A(t+1) = h_l0(t) @ W_hh0, precomputed in the combined matmul

        # Fully unrolled time loop (T static); layer 1 of step t overlaps layer 0 of step t+1.
        for t in range(T):
            first = (t == 0)
            # Per-step x slice stays in the VMEM ref until needed (one aligned vld, off chain).
            x_t = x_ref[t * B:(t + 1) * B, :]                        # (B, 4H), b0 already folded

            # ---- layer 0 ----
            if first:
                if zero_init:
                    g0 = x_t
                else:
                    g0 = x_t + jnp.dot(h_l0_prev, w_hh0,
                                       preferred_element_type=jnp.float32)
            else:
                g0 = x_t + a_next
            h_l0, c_l0 = cell(g0, c_l0, zero_c=(zero_init and first))

            # ---- layer 1 ----
            # Off-critical-path recurrent contribution from the previous h_l1.
            if zero_init and first:
                c_term = None
            else:
                c_term = jnp.dot(h_l1, w_hh1, preferred_element_type=jnp.float32)

            # Critical-path matmul: one (B,H)@(H,8H) dot yields both g1(t)'s input term and
            # g0(t+1)'s recurrent term; split at the lane-128 boundary.
            if t < T - 1:
                p = jnp.dot(h_l0, w_l0out, preferred_element_type=jnp.float32)   # (B, 8H)
                b_term = p[:, 0:4 * H]
                a_next = p[:, 4 * H:8 * H]
            else:
                b_term = jnp.dot(h_l0, w_ih1, preferred_element_type=jnp.float32)

            g1 = b_term + b1 if c_term is None else b_term + c_term + b1
            h_l1, c_l1 = cell(g1, c_l1, zero_c=(zero_init and first))

        hn_ref[0] = h_l0
        hn_ref[1] = h_l1
        cn_ref[0] = c_l0
        cn_ref[1] = c_l1

        # fc (H -> 1) as VPU multiply + lane reduction; dropout(0.3) is identity in eval.
        fc_w = aux_ref[1:2, 0:H]                                      # (1, H)
        fc_b = aux_ref[1:2, H:H + 1]                                  # (1, 1)
        logits = jnp.sum(h_l1 * fc_w, axis=-1, keepdims=True) + fc_b
        sig_ref[...] = jax.nn.sigmoid(logits)

    if zero_init:
        def kernel(x_ref, w_ref, aux_ref, sig_ref, hn_ref, cn_ref):
            body(x_ref, w_ref, aux_ref, None, None, sig_ref, hn_ref, cn_ref)
    else:
        def kernel(x_ref, w_ref, aux_ref, h0_ref, c0_ref, sig_ref, hn_ref, cn_ref):
            body(x_ref, w_ref, aux_ref, h0_ref, c0_ref, sig_ref, hn_ref, cn_ref)
    return kernel


def init_params(key):
    ks = jax.random.split(key, 12)
    H, E, V = HIDDEN_DIM, EMBEDDING_DIM, VOCAB_SIZE
    s = 0.1
    params = {
        "embedding": jax.random.normal(ks[0], (V, E), jnp.float32) * s,
        # layer 0: input size E
        "w_ih_l0": jax.random.normal(ks[1], (4 * H, E), jnp.float32) * s,
        "w_hh_l0": jax.random.normal(ks[2], (4 * H, H), jnp.float32) * s,
        "b_ih_l0": jax.random.normal(ks[3], (4 * H,), jnp.float32) * s,
        "b_hh_l0": jax.random.normal(ks[4], (4 * H,), jnp.float32) * s,
        # layer 1: input size H
        "w_ih_l1": jax.random.normal(ks[5], (4 * H, H), jnp.float32) * s,
        "w_hh_l1": jax.random.normal(ks[6], (4 * H, H), jnp.float32) * s,
        "b_ih_l1": jax.random.normal(ks[7], (4 * H,), jnp.float32) * s,
        "b_hh_l1": jax.random.normal(ks[8], (4 * H,), jnp.float32) * s,
        # fc: (output_size, hidden)
        "fc_w": jax.random.normal(ks[9], (OUTPUT_SIZE, H), jnp.float32) * s,
        "fc_b": jax.random.normal(ks[10], (OUTPUT_SIZE,), jnp.float32) * s,
    }
    return params


def prepare_weights(params):
    """One-time weight prep (outside the per-call path).

    - Folds embedding @ W_ih_l0.T + (b_ih0 + b_hh0) into a (V, 4H) table (constant per model).
    - Packs the three recurrent weight matrices into one (H, 12H) buffer.
    - Packs the layer-1 bias, fc weight row and fc bias into one (2, 4H) buffer.
    """
    H = HIDDEN_DIM
    b0 = params["b_ih_l0"] + params["b_hh_l0"]
    emb_proj = params["embedding"] @ params["w_ih_l0"].T + b0          # (V, 4H)

    w_ih1 = params["w_ih_l1"].T                                        # (H, 4H)
    w_hh0 = params["w_hh_l0"].T                                        # (H, 4H)
    w_hh1 = params["w_hh_l1"].T                                        # (H, 4H)
    w_pack = jnp.concatenate([w_ih1, w_hh0, w_hh1], axis=1)           # (H, 12H)

    b1 = (params["b_ih_l1"] + params["b_hh_l1"]).reshape(1, 4 * H)
    fc_row = jnp.zeros((1, 4 * H), jnp.float32)
    fc_row = fc_row.at[0, :H].set(params["fc_w"][0])
    fc_row = fc_row.at[0, H].set(params["fc_b"][0])
    aux = jnp.concatenate([b1, fc_row], axis=0)                        # (2, 4H)

    return {"emb_proj": emb_proj, "w_pack": w_pack, "aux": aux}


@functools.partial(jax.jit, static_argnames=("zero_init",))
def sentiment_rnn_forward(x_tokens, h0, c0, prepared, zero_init=False):
    """Mirrors SentimentRNN.forward(x, hidden) in eval mode.

    x_tokens: (B, T) int32 token ids
    h0, c0:   (L, B, H) float32 (ignored when zero_init=True, i.e. init_hidden)
    returns (sig_out (B,), (h_n, c_n))
    """
    B, T = x_tokens.shape
    H = HIDDEN_DIM
    L = N_LAYERS

    # Per-call gather of the pre-projected embedding rows (time-major, bias folded in).
    # 32 KB; keeps the gather + the constant matmul out of the kernel's serial prologue.
    tok_tm = jnp.transpose(x_tokens).reshape(T * B)
    x_proj = jnp.take(prepared["emb_proj"], tok_tm, axis=0)           # (T*B, 4H)

    kernel = _make_sentiment_kernel(T, B, H, zero_init)
    vmem = functools.partial(pl.BlockSpec, memory_space=pltpu.MemorySpace.VMEM)

    if zero_init:
        args = (x_proj, prepared["w_pack"], prepared["aux"])
    else:
        args = (x_proj, prepared["w_pack"], prepared["aux"], h0, c0)

    sig, h_n, c_n = pl.pallas_call(
        kernel,
        out_shape=(
            jax.ShapeDtypeStruct((B, OUTPUT_SIZE), jnp.float32),
            jax.ShapeDtypeStruct((L, B, H), jnp.float32),
            jax.ShapeDtypeStruct((L, B, H), jnp.float32),
        ),
        in_specs=[vmem() for _ in range(len(args))],
        out_specs=(vmem(), vmem(), vmem()),
        cost_estimate=pl.CostEstimate(
            flops=1_600_000, transcendentals=37_000, bytes_accessed=95_000),
    )(*args)

    sig_out = sig[:, -1]   # matches sig_out.view(batch, -1)[:, -1]
    return sig_out, (h_n, c_n)


def _reference_forward(x_tokens, h0, c0, params):
    """Pure-JAX reference of the PyTorch forward (eval mode)."""
    H = HIDDEN_DIM
    embeds = jnp.take(params["embedding"], x_tokens, axis=0)          # (B, T, E)

    def cell(x, h, c, w_ih, w_hh, b_ih, b_hh):
        gates = x @ w_ih.T + b_ih + h @ w_hh.T + b_hh
        i = jax.nn.sigmoid(gates[:, 0 * H:1 * H])
        f = jax.nn.sigmoid(gates[:, 1 * H:2 * H])
        g = jnp.tanh(gates[:, 2 * H:3 * H])
        o = jax.nn.sigmoid(gates[:, 3 * H:4 * H])
        c = f * c + i * g
        h = o * jnp.tanh(c)
        return h, c

    h_l0, c_l0 = h0[0], c0[0]
    h_l1, c_l1 = h0[1], c0[1]
    for t in range(x_tokens.shape[1]):
        x_t = embeds[:, t, :]
        h_l0, c_l0 = cell(x_t, h_l0, c_l0, params["w_ih_l0"], params["w_hh_l0"],
                          params["b_ih_l0"], params["b_hh_l0"])
        h_l1, c_l1 = cell(h_l0, h_l1, c_l1, params["w_ih_l1"], params["w_hh_l1"],
                          params["b_ih_l1"], params["b_hh_l1"])
    out = h_l1 @ params["fc_w"].T + params["fc_b"]
    sig = jax.nn.sigmoid(out)[:, -1]
    return sig, (jnp.stack([h_l0, h_l1]), jnp.stack([c_l0, c_l1]))


if __name__ == "__main__":
    key = jax.random.PRNGKey(0)
    k_params, k_tokens, k_h, k_c = jax.random.split(key, 4)

    params = init_params(k_params)
    prepared = prepare_weights(params)
    x_tokens = jax.random.randint(k_tokens, (BATCH, SEQ_LEN), 0, VOCAB_SIZE, dtype=jnp.int32)

    # --- path 1: init_hidden (zero state), specialized kernel ---
    h0 = jnp.zeros((N_LAYERS, BATCH, HIDDEN_DIM), jnp.float32)
    c0 = jnp.zeros((N_LAYERS, BATCH, HIDDEN_DIM), jnp.float32)
    sig_out, (h_n, c_n) = sentiment_rnn_forward(x_tokens, h0, c0, prepared, zero_init=True)
    jax.block_until_ready((sig_out, h_n, c_n))

    ref_sig, (ref_h, ref_c) = _reference_forward(x_tokens, h0, c0, params)
    assert sig_out.shape == (BATCH,)
    assert h_n.shape == (N_LAYERS, BATCH, HIDDEN_DIM)
    assert jnp.allclose(sig_out, ref_sig, atol=1e-4), "sig_out mismatch (zero init)"
    assert jnp.allclose(h_n, ref_h, atol=1e-4), "h_n mismatch (zero init)"
    assert jnp.allclose(c_n, ref_c, atol=1e-4), "c_n mismatch (zero init)"

    # --- path 2: arbitrary hidden state, general kernel ---
    h0r = jax.random.normal(k_h, (N_LAYERS, BATCH, HIDDEN_DIM), jnp.float32) * 0.2
    c0r = jax.random.normal(k_c, (N_LAYERS, BATCH, HIDDEN_DIM), jnp.float32) * 0.2
    sig_out2, (h_n2, c_n2) = sentiment_rnn_forward(x_tokens, h0r, c0r, prepared, zero_init=False)
    jax.block_until_ready((sig_out2, h_n2, c_n2))

    ref_sig2, (ref_h2, ref_c2) = _reference_forward(x_tokens, h0r, c0r, params)
    assert jnp.allclose(sig_out2, ref_sig2, atol=1e-4), "sig_out mismatch (general)"
    assert jnp.allclose(h_n2, ref_h2, atol=1e-4), "h_n mismatch (general)"
    assert jnp.allclose(c_n2, ref_c2, atol=1e-4), "c_n mismatch (general)"

    print("KERNEL_OK")
</pallas_src>

<mosaic_0001>
module attributes {stable_mosaic.version = 11 : i64} {
  func.func @kernel(%arg0: memref<64x128xf32, #tpu.memory_space<vmem>>, %arg1: memref<32x384xf32, #tpu.memory_space<vmem>>, %arg2: memref<2x128xf32, #tpu.memory_space<vmem>>, %arg3: memref<8x1xf32, #tpu.memory_space<vmem>>, %arg4: memref<2x8x32xf32, #tpu.memory_space<vmem>>, %arg5: memref<2x8x32xf32, #tpu.memory_space<vmem>>) attributes {dimension_semantics = [], scalar_prefetch = 0 : i64, scratch_operands = 0 : i64, tpu.core_type = #tpu.core_type<tc>} {
    %c0 = arith.constant 0 : index
    %c0_0 = arith.constant 0 : index
    %0 = vector.load %arg1[%c0, %c0_0] : memref<32x384xf32, #tpu.memory_space<vmem>>, vector<32x256xf32>
    %c0_1 = arith.constant 0 : index
    %c0_2 = arith.constant 0 : index
    %1 = vector.load %arg1[%c0_1, %c0_2] : memref<32x384xf32, #tpu.memory_space<vmem>>, vector<32x128xf32>
    %c0_3 = arith.constant 0 : index
    %c256 = arith.constant 256 : index
    %2 = vector.load %arg1[%c0_3, %c256] : memref<32x384xf32, #tpu.memory_space<vmem>>, vector<32x128xf32>
    %c0_4 = arith.constant 0 : index
    %c0_5 = arith.constant 0 : index
    %3 = vector.load %arg2[%c0_4, %c0_5] : memref<2x128xf32, #tpu.memory_space<vmem>>, vector<1x128xf32>
    %4 = vector.shape_cast %3 : vector<1x128xf32> to vector<1x128xf32>
    %5 = vector.broadcast %4 : vector<1x128xf32> to vector<8x128xf32>
    %c0_6 = arith.constant 0 : index
    %c0_7 = arith.constant 0 : index
    %6 = vector.load %arg0[%c0_6, %c0_7] : memref<64x128xf32, #tpu.memory_space<vmem>>, vector<8x128xf32>
    %7 = arith.negf %6 : vector<8x128xf32>
    %8 = math.exp %7 : vector<8x128xf32>
    %cst = arith.constant 1.000000e+00 : f32
    %9 = vector.broadcast %cst : f32 to vector<8x128xf32>
    %10 = arith.addf %9, %8 : vector<8x128xf32>
    %11 = arith.divf %9, %10 : vector<8x128xf32>
    %12 = math.tanh %6 : vector<8x128xf32>
    %13 = vector.extract_strided_slice %11 {offsets = [0, 0], sizes = [8, 32], strides = [1, 1]} : vector<8x128xf32> to vector<8x32xf32>
    %14 = vector.extract_strided_slice %12 {offsets = [0, 64], sizes = [8, 32], strides = [1, 1]} : vector<8x128xf32> to vector<8x32xf32>
    %15 = vector.extract_strided_slice %11 {offsets = [0, 96], sizes = [8, 32], strides = [1, 1]} : vector<8x128xf32> to vector<8x32xf32>
    %16 = arith.mulf %13, %14 : vector<8x32xf32>
    %17 = math.tanh %16 : vector<8x32xf32>
    %18 = arith.mulf %15, %17 : vector<8x32xf32>
    %cst_8 = arith.constant dense<0.000000e+00> : vector<8x256xf32>
    %19 = tpu.matmul %18, %0, %cst_8 {dimension_numbers = #tpu.dot_dimension_numbers<[1], [0], [0], [1], [0, 0, 1, 1], [], []>} : vector<8x32xf32>, vector<32x256xf32>, vector<8x256xf32> -> vector<8x256xf32>
    %20 = vector.extract_strided_slice %19 {offsets = [0, 0], sizes = [8, 128], strides = [1, 1]} : vector<8x256xf32> to vector<8x128xf32>
    %21 = vector.extract_strided_slice %19 {offsets = [0, 128], sizes = [8, 128], strides = [1, 1]} : vector<8x256xf32> to vector<8x128xf32>
    %22 = arith.addf %20, %5 : vector<8x128xf32>
    %23 = arith.negf %22 : vector<8x128xf32>
    %24 = math.exp %23 : vector<8x128xf32>
    %cst_9 = arith.constant 1.000000e+00 : f32
    %25 = vector.broadcast %cst_9 : f32 to vector<8x128xf32>
    %26 = arith.addf %25, %24 : vector<8x128xf32>
    %27 = arith.divf %25, %26 : vector<8x128xf32>
    %28 = math.tanh %22 : vector<8x128xf32>
    %29 = vector.extract_strided_slice %27 {offsets = [0, 0], sizes = [8, 32], strides = [1, 1]} : vector<8x128xf32> to vector<8x32xf32>
    %30 = vector.extract_strided_slice %28 {offsets = [0, 64], sizes = [8, 32], strides = [1, 1]} : vector<8x128xf32> to vector<8x32xf32>
    %31 = vector.extract_strided_slice %27 {offsets = [0, 96], sizes = [8, 32], strides = [1, 1]} : vector<8x128xf32> to vector<8x32xf32>
    %32 = arith.mulf %29, %30 : vector<8x32xf32>
    %33 = math.tanh %32 : vector<8x32xf32>
    %34 = arith.mulf %31, %33 : vector<8x32xf32>
    %c8 = arith.constant 8 : index
    %c0_10 = arith.constant 0 : index
    %35 = vector.load %arg0[%c8, %c0_10] : memref<64x128xf32, #tpu.memory_space<vmem>>, vector<8x128xf32>
    %36 = arith.addf %35, %21 : vector<8x128xf32>
    %37 = arith.negf %36 : vector<8x128xf32>
    %38 = math.exp %37 : vector<8x128xf32>
    %cst_11 = arith.constant 1.000000e+00 : f32
    %39 = vector.broadcast %cst_11 : f32 to vector<8x128xf32>
    %40 = arith.addf %39, %38 : vector<8x128xf32>
    %41 = arith.divf %39, %40 : vector<8x128xf32>
    %42 = math.tanh %36 : vector<8x128xf32>
    %43 = vector.extract_strided_slice %41 {offsets = [0, 0], sizes = [8, 32], strides = [1, 1]} : vector<8x128xf32> to vector<8x32xf32>
    %44 = vector.extract_strided_slice %41 {offsets = [0, 32], sizes = [8, 32], strides = [1, 1]} : vector<8x128xf32> to vector<8x32xf32>
    %45 = vector.extract_strided_slice %42 {offsets = [0, 64], sizes = [8, 32], strides = [1, 1]} : vector<8x128xf32> to vector<8x32xf32>
    %46 = vector.extract_strided_slice %41 {offsets = [0, 96], sizes = [8, 32], strides = [1, 1]} : vector<8x128xf32> to vector<8x32xf32>
    %47 = arith.mulf %44, %16 : vector<8x32xf32>
    %48 = arith.mulf %43, %45 : vector<8x32xf32>
    %49 = arith.addf %47, %48 : vector<8x32xf32>
    %50 = math.tanh %49 : vector<8x32xf32>
    %51 = arith.mulf %46, %50 : vector<8x32xf32>
    %cst_12 = arith.constant dense<0.000000e+00> : vector<8x128xf32>
    %52 = tpu.matmul %34, %2, %cst_12 {dimension_numbers = #tpu.dot_dimension_numbers<[1], [0], [0], [1], [0, 0, 1, 1], [], []>} : vector<8x32xf32>, vector<32x128xf32>, vector<8x128xf32> -> vector<8x128xf32>
    %cst_13 = arith.constant dense<0.000000e+00> : vector<8x256xf32>
    %53 = tpu.matmul %51, %0, %cst_13 {dimension_numbers = #tpu.dot_dimension_numbers<[1], [0], [0], [1], [0, 0, 1, 1], [], []>} : vector<8x32xf32>, vector<32x256xf32>, vector<8x256xf32> -> vector<8x256xf32>
    %54 = vector.extract_strided_slice %53 {offsets = [0, 0], sizes = [8, 128], strides = [1, 1]} : vector<8x256xf32> to vector<8x128xf32>
    %55 = vector.extract_strided_slice %53 {offsets = [0, 128], sizes = [8, 128], strides = [1, 1]} : vector<8x256xf32> to vector<8x128xf32>
    %56 = arith.addf %54, %52 : vector<8x128xf32>
    %57 = arith.addf %56, %5 : vector<8x128xf32>
    %58 = arith.negf %57 : vector<8x128xf32>
    %59 = math.exp %58 : vector<8x128xf32>
    %cst_14 = arith.constant 1.000000e+00 : f32
    %60 = vector.broadcast %cst_14 : f32 to vector<8x128xf32>
    %61 = arith.addf %60, %59 : vector<8x128xf32>
    %62 = arith.divf %60, %61 : vector<8x128xf32>
    %63 = math.tanh %57 : vector<8x128xf32>
    %64 = vector.extract_strided_slice %62 {offsets = [0, 0], sizes = [8, 32], strides = [1, 1]} : vector<8x128xf32> to vector<8x32xf32>
    %65 = vector.extract_strided_slice %62 {offsets = [0, 32], sizes = [8, 32], strides = [1, 1]} : vector<8x128xf32> to vector<8x32xf32>
    %66 = vector.extract_strided_slice %63 {offsets = [0, 64], sizes = [8, 32], strides = [1, 1]} : vector<8x128xf32> to vector<8x32xf32>
    %67 = vector.extract_strided_slice %62 {offsets = [0, 96], sizes = [8, 32], strides = [1, 1]} : vector<8x128xf32> to vector<8x32xf32>
    %68 = arith.mulf %65, %32 : vector<8x32xf32>
    %69 = arith.mulf %64, %66 : vector<8x32xf32>
    %70 = arith.addf %68, %69 : vector<8x32xf32>
    %71 = math.tanh %70 : vector<8x32xf32>
    %72 = arith.mulf %67, %71 : vector<8x32xf32>
    %c16 = arith.constant 16 : index
    %c0_15 = arith.constant 0 : index
    %73 = vector.load %arg0[%c16, %c0_15] : memref<64x128xf32, #tpu.memory_space<vmem>>, vector<8x128xf32>
    %74 = arith.addf %73, %55 : vector<8x128xf32>
    %75 = arith.negf %74 : vector<8x128xf32>
    %76 = math.exp %75 : vector<8x128xf32>
    %cst_16 = arith.constant 1.000000e+00 : f32
    %77 = vector.broadcast %cst_16 : f32 to vector<8x128xf32>
    %78 = arith.addf %77, %76 : vector<8x128xf32>
    %79 = arith.divf %77, %78 : vector<8x128xf32>
    %80 = math.tanh %74 : vector<8x128xf32>
    %81 = vector.extract_strided_slice %79 {offsets = [0, 0], sizes = [8, 32], strides = [1, 1]} : vector<8x128xf32> to vector<8x32xf32>
    %82 = vector.extract_strided_slice %79 {offsets = [0, 32], sizes = [8, 32], strides = [1, 1]} : vector<8x128xf32> to vector<8x32xf32>
    %83 = vector.extract_strided_slice %80 {offsets = [0, 64], sizes = [8, 32], strides = [1, 1]} : vector<8x128xf32> to vector<8x32xf32>
    %84 = vector.extract_strided_slice %79 {offsets = [0, 96], sizes = [8, 32], strides = [1, 1]} : vector<8x128xf32> to vector<8x32xf32>
    %85 = arith.mulf %82, %49 : vector<8x32xf32>
    %86 = arith.mulf %81, %83 : vector<8x32xf32>
    %87 = arith.addf %85, %86 : vector<8x32xf32>
    %88 = math.tanh %87 : vector<8x32xf32>
    %89 = arith.mulf %84, %88 : vector<8x32xf32>
    %cst_17 = arith.constant dense<0.000000e+00> : vector<8x128xf32>
    %90 = tpu.matmul %72, %2, %cst_17 {dimension_numbers = #tpu.dot_dimension_numbers<[1], [0], [0], [1], [0, 0, 1, 1], [], []>} : vector<8x32xf32>, vector<32x128xf32>, vector<8x128xf32> -> vector<8x128xf32>
    %cst_18 = arith.constant dense<0.000000e+00> : vector<8x256xf32>
    %91 = tpu.matmul %89, %0, %cst_18 {dimension_numbers = #tpu.dot_dimension_numbers<[1], [0], [0], [1], [0, 0, 1, 1], [], []>} : vector<8x32xf32>, vector<32x256xf32>, vector<8x256xf32> -> vector<8x256xf32>
    %92 = vector.extract_strided_slice %91 {offsets = [0, 0], sizes = [8, 128], strides = [1, 1]} : vector<8x256xf32> to vector<8x128xf32>
    %93 = vector.extract_strided_slice %91 {offsets = [0, 128], sizes = [8, 128], strides = [1, 1]} : vector<8x256xf32> to vector<8x128xf32>
    %94 = arith.addf %92, %90 : vector<8x128xf32>
    %95 = arith.addf %94, %5 : vector<8x128xf32>
    %96 = arith.negf %95 : vector<8x128xf32>
    %97 = math.exp %96 : vector<8x128xf32>
    %cst_19 = arith.constant 1.000000e+00 : f32
    %98 = vector.broadcast %cst_19 : f32 to vector<8x128xf32>
    %99 = arith.addf %98, %97 : vector<8x128xf32>
    %100 = arith.divf %98, %99 : vector<8x128xf32>
    %101 = math.tanh %95 : vector<8x128xf32>
    %102 = vector.extract_strided_slice %100 {offsets = [0, 0], sizes = [8, 32], strides = [1, 1]} : vector<8x128xf32> to vector<8x32xf32>
    %103 = vector.extract_strided_slice %100 {offsets = [0, 32], sizes = [8, 32], strides = [1, 1]} : vector<8x128xf32> to vector<8x32xf32>
    %104 = vector.extract_strided_slice %101 {offsets = [0, 64], sizes = [8, 32], strides = [1, 1]} : vector<8x128xf32> to vector<8x32xf32>
    %105 = vector.extract_strided_slice %100 {offsets = [0, 96], sizes = [8, 32], strides = [1, 1]} : vector<8x128xf32> to vector<8x32xf32>
    %106 = arith.mulf %103, %70 : vector<8x32xf32>
    %107 = arith.mulf %102, %104 : vector<8x32xf32>
    %108 = arith.addf %106, %107 : vector<8x32xf32>
    %109 = math.tanh %108 : vector<8x32xf32>
    %110 = arith.mulf %105, %109 : vector<8x32xf32>
    %c24 = arith.constant 24 : index
    %c0_20 = arith.constant 0 : index
    %111 = vector.load %arg0[%c24, %c0_20] : memref<64x128xf32, #tpu.memory_space<vmem>>, vector<8x128xf32>
    %112 = arith.addf %111, %93 : vector<8x128xf32>
    %113 = arith.negf %112 : vector<8x128xf32>
    %114 = math.exp %113 : vector<8x128xf32>
    %cst_21 = arith.constant 1.000000e+00 : f32
    %115 = vector.broadcast %cst_21 : f32 to vector<8x128xf32>
    %116 = arith.addf %115, %114 : vector<8x128xf32>
    %117 = arith.divf %115, %116 : vector<8x128xf32>
    %118 = math.tanh %112 : vector<8x128xf32>
    %119 = vector.extract_strided_slice %117 {offsets = [0, 0], sizes = [8, 32], strides = [1, 1]} : vector<8x128xf32> to vector<8x32xf32>
    %120 = vector.extract_strided_slice %117 {offsets = [0, 32], sizes = [8, 32], strides = [1, 1]} : vector<8x128xf32> to vector<8x32xf32>
    %121 = vector.extract_strided_slice %118 {offsets = [0, 64], sizes = [8, 32], strides = [1, 1]} : vector<8x128xf32> to vector<8x32xf32>
    %122 = vector.extract_strided_slice %117 {offsets = [0, 96], sizes = [8, 32], strides = [1, 1]} : vector<8x128xf32> to vector<8x32xf32>
    %123 = arith.mulf %120, %87 : vector<8x32xf32>
    %124 = arith.mulf %119, %121 : vector<8x32xf32>
    %125 = arith.addf %123, %124 : vector<8x32xf32>
    %126 = math.tanh %125 : vector<8x32xf32>
    %127 = arith.mulf %122, %126 : vector<8x32xf32>
    %cst_22 = arith.constant dense<0.000000e+00> : vector<8x128xf32>
    %128 = tpu.matmul %110, %2, %cst_22 {dimension_numbers = #tpu.dot_dimension_numbers<[1], [0], [0], [1], [0, 0, 1, 1], [], []>} : vector<8x32xf32>, vector<32x128xf32>, vector<8x128xf32> -> vector<8x128xf32>
    %cst_23 = arith.constant dense<0.000000e+00> : vector<8x256xf32>
    %129 = tpu.matmul %127, %0, %cst_23 {dimension_numbers = #tpu.dot_dimension_numbers<[1], [0], [0], [1], [0, 0, 1, 1], [], []>} : vector<8x32xf32>, vector<32x256xf32>, vector<8x256xf32> -> vector<8x256xf32>
    %130 = vector.extract_strided_slice %129 {offsets = [0, 0], sizes = [8, 128], strides = [1, 1]} : vector<8x256xf32> to vector<8x128xf32>
    %131 = vector.extract_strided_slice %129 {offsets = [0, 128], sizes = [8, 128], strides = [1, 1]} : vector<8x256xf32> to vector<8x128xf32>
    %132 = arith.addf %130, %128 : vector<8x128xf32>
    %133 = arith.addf %132, %5 : vector<8x128xf32>
    %134 = arith.negf %133 : vector<8x128xf32>
    %135 = math.exp %134 : vector<8x128xf32>
    %cst_24 = arith.constant 1.000000e+00 : f32
    %136 = vector.broadcast %cst_24 : f32 to vector<8x128xf32>
    %137 = arith.addf %136, %135 : vector<8x128xf32>
    %138 = arith.divf %136, %137 : vector<8x128xf32>
    %139 = math.tanh %133 : vector<8x128xf32>
    %140 = vector.extract_strided_slice %138 {offsets = [0, 0], sizes = [8, 32], strides = [1, 1]} : vector<8x128xf32> to vector<8x32xf32>
    %141 = vector.extract_strided_slice %138 {offsets = [0, 32], sizes = [8, 32], strides = [1, 1]} : vector<8x128xf32> to vector<8x32xf32>
    %142 = vector.extract_strided_slice %139 {offsets = [0, 64], sizes = [8, 32], strides = [1, 1]} : vector<8x128xf32> to vector<8x32xf32>
    %143 = vector.extract_strided_slice %138 {offsets = [0, 96], sizes = [8, 32], strides = [1, 1]} : vector<8x128xf32> to vector<8x32xf32>
    %144 = arith.mulf %141, %108 : vector<8x32xf32>
    %145 = arith.mulf %140, %142 : vector<8x32xf32>
    %146 = arith.addf %144, %145 : vector<8x32xf32>
    %147 = math.tanh %146 : vector<8x32xf32>
    %148 = arith.mulf %143, %147 : vector<8x32xf32>
    %c32 = arith.constant 32 : index
    %c0_25 = arith.constant 0 : index
    %149 = vector.load %arg0[%c32, %c0_25] : memref<64x128xf32, #tpu.memory_space<vmem>>, vector<8x128xf32>
    %150 = arith.addf %149, %131 : vector<8x128xf32>
    %151 = arith.negf %150 : vector<8x128xf32>
    %152 = math.exp %151 : vector<8x128xf32>
    %cst_26 = arith.constant 1.000000e+00 : f32
    %153 = vector.broadcast %cst_26 : f32 to vector<8x128xf32>
    %154 = arith.addf %153, %152 : vector<8x128xf32>
    %155 = arith.divf %153, %154 : vector<8x128xf32>
    %156 = math.tanh %150 : vector<8x128xf32>
    %157 = vector.extract_strided_slice %155 {offsets = [0, 0], sizes = [8, 32], strides = [1, 1]} : vector<8x128xf32> to vector<8x32xf32>
    %158 = vector.extract_strided_slice %155 {offsets = [0, 32], sizes = [8, 32], strides = [1, 1]} : vector<8x128xf32> to vector<8x32xf32>
    %159 = vector.extract_strided_slice %156 {offsets = [0, 64], sizes = [8, 32], strides = [1, 1]} : vector<8x128xf32> to vector<8x32xf32>
    %160 = vector.extract_strided_slice %155 {offsets = [0, 96], sizes = [8, 32], strides = [1, 1]} : vector<8x128xf32> to vector<8x32xf32>
    %161 = arith.mulf %158, %125 : vector<8x32xf32>
    %162 = arith.mulf %157, %159 : vector<8x32xf32>
    %163 = arith.addf %161, %162 : vector<8x32xf32>
    %164 = math.tanh %163 : vector<8x32xf32>
    %165 = arith.mulf %160, %164 : vector<8x32xf32>
    %cst_27 = arith.constant dense<0.000000e+00> : vector<8x128xf32>
    %166 = tpu.matmul %148, %2, %cst_27 {dimension_numbers = #tpu.dot_dimension_numbers<[1], [0], [0], [1], [0, 0, 1, 1], [], []>} : vector<8x32xf32>, vector<32x128xf32>, vector<8x128xf32> -> vector<8x128xf32>
    %cst_28 = arith.constant dense<0.000000e+00> : vector<8x256xf32>
    %167 = tpu.matmul %165, %0, %cst_28 {dimension_numbers = #tpu.dot_dimension_numbers<[1], [0], [0], [1], [0, 0, 1, 1], [], []>} : vector<8x32xf32>, vector<32x256xf32>, vector<8x256xf32> -> vector<8x256xf32>
    %168 = vector.extract_strided_slice %167 {offsets = [0, 0], sizes = [8, 128], strides = [1, 1]} : vector<8x256xf32> to vector<8x128xf32>
    %169 = vector.extract_strided_slice %167 {offsets = [0, 128], sizes = [8, 128], strides = [1, 1]} : vector<8x256xf32> to vector<8x128xf32>
    %170 = arith.addf %168, %166 : vector<8x128xf32>
    %171 = arith.addf %170, %5 : vector<8x128xf32>
    %172 = arith.negf %171 : vector<8x128xf32>
    %173 = math.exp %172 : vector<8x128xf32>
    %cst_29 = arith.constant 1.000000e+00 : f32
    %174 = vector.broadcast %cst_29 : f32 to vector<8x128xf32>
    %175 = arith.addf %174, %173 : vector<8x128xf32>
    %176 = arith.divf %174, %175 : vector<8x128xf32>
    %177 = math.tanh %171 : vector<8x128xf32>
    %178 = vector.extract_strided_slice %176 {offsets = [0, 0], sizes = [8, 32], strides = [1, 1]} : vector<8x128xf32> to vector<8x32xf32>
    %179 = vector.extract_strided_slice %176 {offsets = [0, 32], sizes = [8, 32], strides = [1, 1]} : vector<8x128xf32> to vector<8x32xf32>
    %180 = vector.extract_strided_slice %177 {offsets = [0, 64], sizes = [8, 32], strides = [1, 1]} : vector<8x128xf32> to vector<8x32xf32>
    %181 = vector.extract_strided_slice %176 {offsets = [0, 96], sizes = [8, 32], strides = [1, 1]} : vector<8x128xf32> to vector<8x32xf32>
    %182 = arith.mulf %179, %146 : vector<8x32xf32>
    %183 = arith.mulf %178, %180 : vector<8x32xf32>
    %184 = arith.addf %182, %183 : vector<8x32xf32>
    %185 = math.tanh %184 : vector<8x32xf32>
    %186 = arith.mulf %181, %185 : vector<8x32xf32>
    %c40 = arith.constant 40 : index
    %c0_30 = arith.constant 0 : index
    %187 = vector.load %arg0[%c40, %c0_30] : memref<64x128xf32, #tpu.memory_space<vmem>>, vector<8x128xf32>
    %188 = arith.addf %187, %169 : vector<8x128xf32>
    %189 = arith.negf %188 : vector<8x128xf32>
    %190 = math.exp %189 : vector<8x128xf32>
    %cst_31 = arith.constant 1.000000e+00 : f32
    %191 = vector.broadcast %cst_31 : f32 to vector<8x128xf32>
    %192 = arith.addf %191, %190 : vector<8x128xf32>
    %193 = arith.divf %191, %192 : vector<8x128xf32>
    %194 = math.tanh %188 : vector<8x128xf32>
    %195 = vector.extract_strided_slice %193 {offsets = [0, 0], sizes = [8, 32], strides = [1, 1]} : vector<8x128xf32> to vector<8x32xf32>
    %196 = vector.extract_strided_slice %193 {offsets = [0, 32], sizes = [8, 32], strides = [1, 1]} : vector<8x128xf32> to vector<8x32xf32>
    %197 = vector.extract_strided_slice %194 {offsets = [0, 64], sizes = [8, 32], strides = [1, 1]} : vector<8x128xf32> to vector<8x32xf32>
    %198 = vector.extract_strided_slice %193 {offsets = [0, 96], sizes = [8, 32], strides = [1, 1]} : vector<8x128xf32> to vector<8x32xf32>
    %199 = arith.mulf %196, %163 : vector<8x32xf32>
    %200 = arith.mulf %195, %197 : vector<8x32xf32>
    %201 = arith.addf %199, %200 : vector<8x32xf32>
    %202 = math.tanh %201 : vector<8x32xf32>
    %203 = arith.mulf %198, %202 : vector<8x32xf32>
    %cst_32 = arith.constant dense<0.000000e+00> : vector<8x128xf32>
    %204 = tpu.matmul %186, %2, %cst_32 {dimension_numbers = #tpu.dot_dimension_numbers<[1], [0], [0], [1], [0, 0, 1, 1], [], []>} : vector<8x32xf32>, vector<32x128xf32>, vector<8x128xf32> -> vector<8x128xf32>
    %cst_33 = arith.constant dense<0.000000e+00> : vector<8x256xf32>
    %205 = tpu.matmul %203, %0, %cst_33 {dimension_numbers = #tpu.dot_dimension_numbers<[1], [0], [0], [1], [0, 0, 1, 1], [], []>} : vector<8x32xf32>, vector<32x256xf32>, vector<8x256xf32> -> vector<8x256xf32>
    %206 = vector.extract_strided_slice %205 {offsets = [0, 0], sizes = [8, 128], strides = [1, 1]} : vector<8x256xf32> to vector<8x128xf32>
    %207 = vector.extract_strided_slice %205 {offsets = [0, 128], sizes = [8, 128], strides = [1, 1]} : vector<8x256xf32> to vector<8x128xf32>
    %208 = arith.addf %206, %204 : vector<8x128xf32>
    %209 = arith.addf %208, %5 : vector<8x128xf32>
    %210 = arith.negf %209 : vector<8x128xf32>
    %211 = math.exp %210 : vector<8x128xf32>
    %cst_34 = arith.constant 1.000000e+00 : f32
    %212 = vector.broadcast %cst_34 : f32 to vector<8x128xf32>
    %213 = arith.addf %212, %211 : vector<8x128xf32>
    %214 = arith.divf %212, %213 : vector<8x128xf32>
    %215 = math.tanh %209 : vector<8x128xf32>
    %216 = vector.extract_strided_slice %214 {offsets = [0, 0], sizes = [8, 32], strides = [1, 1]} : vector<8x128xf32> to vector<8x32xf32>
    %217 = vector.extract_strided_slice %214 {offsets = [0, 32], sizes = [8, 32], strides = [1, 1]} : vector<8x128xf32> to vector<8x32xf32>
    %218 = vector.extract_strided_slice %215 {offsets = [0, 64], sizes = [8, 32], strides = [1, 1]} : vector<8x128xf32> to vector<8x32xf32>
    %219 = vector.extract_strided_slice %214 {offsets = [0, 96], sizes = [8, 32], strides = [1, 1]} : vector<8x128xf32> to vector<8x32xf32>
    %220 = arith.mulf %217, %184 : vector<8x32xf32>
    %221 = arith.mulf %216, %218 : vector<8x32xf32>
    %222 = arith.addf %220, %221 : vector<8x32xf32>
    %223 = math.tanh %222 : vector<8x32xf32>
    %224 = arith.mulf %219, %223 : vector<8x32xf32>
    %c48 = arith.constant 48 : index
    %c0_35 = arith.constant 0 : index
    %225 = vector.load %arg0[%c48, %c0_35] : memref<64x128xf32, #tpu.memory_space<vmem>>, vector<8x128xf32>
    %226 = arith.addf %225, %207 : vector<8x128xf32>
    %227 = arith.negf %226 : vector<8x128xf32>
    %228 = math.exp %227 : vector<8x128xf32>
    %cst_36 = arith.constant 1.000000e+00 : f32
    %229 = vector.broadcast %cst_36 : f32 to vector<8x128xf32>
    %230 = arith.addf %229, %228 : vector<8x128xf32>
    %231 = arith.divf %229, %230 : vector<8x128xf32>
    %232 = math.tanh %226 : vector<8x128xf32>
    %233 = vector.extract_strided_slice %231 {offsets = [0, 0], sizes = [8, 32], strides = [1, 1]} : vector<8x128xf32> to vector<8x32xf32>
    %234 = vector.extract_strided_slice %231 {offsets = [0, 32], sizes = [8, 32], strides = [1, 1]} : vector<8x128xf32> to vector<8x32xf32>
    %235 = vector.extract_strided_slice %232 {offsets = [0, 64], sizes = [8, 32], strides = [1, 1]} : vector<8x128xf32> to vector<8x32xf32>
    %236 = vector.extract_strided_slice %231 {offsets = [0, 96], sizes = [8, 32], strides = [1, 1]} : vector<8x128xf32> to vector<8x32xf32>
    %237 = arith.mulf %234, %201 : vector<8x32xf32>
    %238 = arith.mulf %233, %235 : vector<8x32xf32>
    %239 = arith.addf %237, %238 : vector<8x32xf32>
    %240 = math.tanh %239 : vector<8x32xf32>
    %241 = arith.mulf %236, %240 : vector<8x32xf32>
    %cst_37 = arith.constant dense<0.000000e+00> : vector<8x128xf32>
    %242 = tpu.matmul %224, %2, %cst_37 {dimension_numbers = #tpu.dot_dimension_numbers<[1], [0], [0], [1], [0, 0, 1, 1], [], []>} : vector<8x32xf32>, vector<32x128xf32>, vector<8x128xf32> -> vector<8x128xf32>
    %cst_38 = arith.constant dense<0.000000e+00> : vector<8x256xf32>
    %243 = tpu.matmul %241, %0, %cst_38 {dimension_numbers = #tpu.dot_dimension_numbers<[1], [0], [0], [1], [0, 0, 1, 1], [], []>} : vector<8x32xf32>, vector<32x256xf32>, vector<8x256xf32> -> vector<8x256xf32>
    %244 = vector.extract_strided_slice %243 {offsets = [0, 0], sizes = [8, 128], strides = [1, 1]} : vector<8x256xf32> to vector<8x128xf32>
    %245 = vector.extract_strided_slice %243 {offsets = [0, 128], sizes = [8, 128], strides = [1, 1]} : vector<8x256xf32> to vector<8x128xf32>
    %246 = arith.addf %244, %242 : vector<8x128xf32>
    %247 = arith.addf %246, %5 : vector<8x128xf32>
    %248 = arith.negf %247 : vector<8x128xf32>
    %249 = math.exp %248 : vector<8x128xf32>
    %cst_39 = arith.constant 1.000000e+00 : f32
    %250 = vector.broadcast %cst_39 : f32 to vector<8x128xf32>
    %251 = arith.addf %250, %249 : vector<8x128xf32>
    %252 = arith.divf %250, %251 : vector<8x128xf32>
    %253 = math.tanh %247 : vector<8x128xf32>
    %254 = vector.extract_strided_slice %252 {offsets = [0, 0], sizes = [8, 32], strides = [1, 1]} : vector<8x128xf32> to vector<8x32xf32>
    %255 = vector.extract_strided_slice %252 {offsets = [0, 32], sizes = [8, 32], strides = [1, 1]} : vector<8x128xf32> to vector<8x32xf32>
    %256 = vector.extract_strided_slice %253 {offsets = [0, 64], sizes = [8, 32], strides = [1, 1]} : vector<8x128xf32> to vector<8x32xf32>
    %257 = vector.extract_strided_slice %252 {offsets = [0, 96], sizes = [8, 32], strides = [1, 1]} : vector<8x128xf32> to vector<8x32xf32>
    %258 = arith.mulf %255, %222 : vector<8x32xf32>
    %259 = arith.mulf %254, %256 : vector<8x32xf32>
    %260 = arith.addf %258, %259 : vector<8x32xf32>
    %261 = math.tanh %260 : vector<8x32xf32>
    %262 = arith.mulf %257, %261 : vector<8x32xf32>
    %c56 = arith.constant 56 : index
    %c0_40 = arith.constant 0 : index
    %263 = vector.load %arg0[%c56, %c0_40] : memref<64x128xf32, #tpu.memory_space<vmem>>, vector<8x128xf32>
    %264 = arith.addf %263, %245 : vector<8x128xf32>
    %265 = arith.negf %264 : vector<8x128xf32>
    %266 = math.exp %265 : vector<8x128xf32>
    %cst_41 = arith.constant 1.000000e+00 : f32
    %267 = vector.broadcast %cst_41 : f32 to vector<8x128xf32>
    %268 = arith.addf %267, %266 : vector<8x128xf32>
    %269 = arith.divf %267, %268 : vector<8x128xf32>
    %270 = math.tanh %264 : vector<8x128xf32>
    %271 = vector.extract_strided_slice %269 {offsets = [0, 0], sizes = [8, 32], strides = [1, 1]} : vector<8x128xf32> to vector<8x32xf32>
    %272 = vector.extract_strided_slice %269 {offsets = [0, 32], sizes = [8, 32], strides = [1, 1]} : vector<8x128xf32> to vector<8x32xf32>
    %273 = vector.extract_strided_slice %270 {offsets = [0, 64], sizes = [8, 32], strides = [1, 1]} : vector<8x128xf32> to vector<8x32xf32>
    %274 = vector.extract_strided_slice %269 {offsets = [0, 96], sizes = [8, 32], strides = [1, 1]} : vector<8x128xf32> to vector<8x32xf32>
    %275 = arith.mulf %272, %239 : vector<8x32xf32>
    %276 = arith.mulf %271, %273 : vector<8x32xf32>
    %277 = arith.addf %275, %276 : vector<8x32xf32>
    %278 = math.tanh %277 : vector<8x32xf32>
    %279 = arith.mulf %274, %278 : vector<8x32xf32>
    %cst_42 = arith.constant dense<0.000000e+00> : vector<8x128xf32>
    %280 = tpu.matmul %262, %2, %cst_42 {dimension_numbers = #tpu.dot_dimension_numbers<[1], [0], [0], [1], [0, 0, 1, 1], [], []>} : vector<8x32xf32>, vector<32x128xf32>, vector<8x128xf32> -> vector<8x128xf32>
    %cst_43 = arith.constant dense<0.000000e+00> : vector<8x128xf32>
    %281 = tpu.matmul %279, %1, %cst_43 {dimension_numbers = #tpu.dot_dimension_numbers<[1], [0], [0], [1], [0, 0, 1, 1], [], []>} : vector<8x32xf32>, vector<32x128xf32>, vector<8x128xf32> -> vector<8x128xf32>
    %282 = arith.addf %281, %280 : vector<8x128xf32>
    %283 = arith.addf %282, %5 : vector<8x128xf32>
    %284 = arith.negf %283 : vector<8x128xf32>
    %285 = math.exp %284 : vector<8x128xf32>
    %cst_44 = arith.constant 1.000000e+00 : f32
    %286 = vector.broadcast %cst_44 : f32 to vector<8x128xf32>
    %287 = arith.addf %286, %285 : vector<8x128xf32>
    %288 = arith.divf %286, %287 : vector<8x128xf32>
    %289 = math.tanh %283 : vector<8x128xf32>
    %290 = vector.extract_strided_slice %288 {offsets = [0, 0], sizes = [8, 32], strides = [1, 1]} : vector<8x128xf32> to vector<8x32xf32>
    %291 = vector.extract_strided_slice %288 {offsets = [0, 32], sizes = [8, 32], strides = [1, 1]} : vector<8x128xf32> to vector<8x32xf32>
    %292 = vector.extract_strided_slice %289 {offsets = [0, 64], sizes = [8, 32], strides = [1, 1]} : vector<8x128xf32> to vector<8x32xf32>
    %293 = vector.extract_strided_slice %288 {offsets = [0, 96], sizes = [8, 32], strides = [1, 1]} : vector<8x128xf32> to vector<8x32xf32>
    %294 = arith.mulf %291, %260 : vector<8x32xf32>
    %295 = arith.mulf %290, %292 : vector<8x32xf32>
    %296 = arith.addf %294, %295 : vector<8x32xf32>
    %297 = math.tanh %296 : vector<8x32xf32>
    %298 = arith.mulf %293, %297 : vector<8x32xf32>
    %c0_45 = arith.constant 0 : index
    %c0_46 = arith.constant 0 : index
    %c0_47 = arith.constant 0 : index
    %299 = vector.load %arg4[%c0_45, %c0_46, %c0_47] : memref<2x8x32xf32, #tpu.memory_space<vmem>>, vector<1x8x32xf32>
    %300 = vector.shape_cast %299 : vector<1x8x32xf32> to vector<8x32xf32>
    %301 = vector.shape_cast %279 : vector<8x32xf32> to vector<1x8x32xf32>
    tpu.vector_store %arg4[%c0_45, %c0_46, %c0_47], %301 {strides = array<i32>} : memref<2x8x32xf32, #tpu.memory_space<vmem>>, vector<1x8x32xf32>,
    %c1 = arith.constant 1 : index
    %c0_48 = arith.constant 0 : index
    %c0_49 = arith.constant 0 : index
    %302 = vector.load %arg4[%c1, %c0_48, %c0_49] : memref<2x8x32xf32, #tpu.memory_space<vmem>>, vector<1x8x32xf32>
    %303 = vector.shape_cast %302 : vector<1x8x32xf32> to vector<8x32xf32>
    %304 = vector.shape_cast %298 : vector<8x32xf32> to vector<1x8x32xf32>
    tpu.vector_store %arg4[%c1, %c0_48, %c0_49], %304 {strides = array<i32>} : memref<2x8x32xf32, #tpu.memory_space<vmem>>, vector<1x8x32xf32>,
    %c0_50 = arith.constant 0 : index
    %c0_51 = arith.constant 0 : index
    %c0_52 = arith.constant 0 : index
    %305 = vector.load %arg5[%c0_50, %c0_51, %c0_52] : memref<2x8x32xf32, #tpu.memory_space<vmem>>, vector<1x8x32xf32>
    %306 = vector.shape_cast %305 : vector<1x8x32xf32> to vector<8x32xf32>
    %307 = vector.shape_cast %277 : vector<8x32xf32> to vector<1x8x32xf32>
    tpu.vector_store %arg5[%c0_50, %c0_51, %c0_52], %307 {strides = array<i32>} : memref<2x8x32xf32, #tpu.memory_space<vmem>>, vector<1x8x32xf32>,
    %c1_53 = arith.constant 1 : index
    %c0_54 = arith.constant 0 : index
    %c0_55 = arith.constant 0 : index
    %308 = vector.load %arg5[%c1_53, %c0_54, %c0_55] : memref<2x8x32xf32, #tpu.memory_space<vmem>>, vector<1x8x32xf32>
    %309 = vector.shape_cast %308 : vector<1x8x32xf32> to vector<8x32xf32>
    %310 = vector.shape_cast %296 : vector<8x32xf32> to vector<1x8x32xf32>
    tpu.vector_store %arg5[%c1_53, %c0_54, %c0_55], %310 {strides = array<i32>} : memref<2x8x32xf32, #tpu.memory_space<vmem>>, vector<1x8x32xf32>,
    %c1_56 = arith.constant 1 : index
    %c0_57 = arith.constant 0 : index
    %311 = vector.load %arg2[%c1_56, %c0_57] : memref<2x128xf32, #tpu.memory_space<vmem>>, vector<1x32xf32>
    %c1_58 = arith.constant 1 : index
    %c32_59 = arith.constant 32 : index
    %312 = vector.load %arg2[%c1_58, %c32_59] : memref<2x128xf32, #tpu.memory_space<vmem>>, vector<1x1xf32>
    %313 = vector.broadcast %311 : vector<1x32xf32> to vector<8x32xf32>
    %314 = arith.mulf %298, %313 : vector<8x32xf32>
    %cst_60 = arith.constant dense<0.000000e+00> : vector<8xf32>
    %315 = vector.multi_reduction <add>, %314, %cst_60 [1] : vector<8x32xf32> to vector<8xf32>
    %316 = vector.shape_cast %315 : vector<8xf32> to vector<8x1xf32>
    %317 = vector.broadcast %312 : vector<1x1xf32> to vector<8x1xf32>
    %318 = arith.addf %316, %317 : vector<8x1xf32>
    %319 = arith.negf %318 : vector<8x1xf32>
    %320 = math.exp %319 : vector<8x1xf32>
    %cst_61 = arith.constant 1.000000e+00 : f32
    %321 = vector.broadcast %cst_61 : f32 to vector<8x1xf32>
    %322 = arith.addf %321, %320 : vector<8x1xf32>
    %323 = arith.divf %321, %322 : vector<8x1xf32>
    %c0_62 = arith.constant 0 : index
    %c0_63 = arith.constant 0 : index
    %324 = vector.load %arg3[%c0_62, %c0_63] : memref<8x1xf32, #tpu.memory_space<vmem>>, vector<8x1xf32>
    tpu.vector_store %arg3[%c0_62, %c0_63], %323 {strides = array<i32>} : memref<8x1xf32, #tpu.memory_space<vmem>>, vector<8x1xf32>,
    return
  }
}

</mosaic_0001>

<bundles_post_ra>
// kernel: sentiment_rnn_forward.1
= control target key start
LH: loop header
LB: loop body
LE: loop exit
PB: predicated region body
PF: predicated region fallthrough
CT: control target
= control target key end

     0   :  { %11 = vsyncpa [#allocation3], 0  ;;  %s2453_s0 = inlined_call_operand.vmem [shape: f32[64,128], index: 0, kind: input, shape index: {}]   ;;  %s2454_s1 = inlined_call_operand.vmem [shape: f32[32,384], index: 1, kind: input, shape index: {}]   ;;  %s2455_s2 = inlined_call_operand.vmem [shape: f32[2,128], index: 2, kind: input, shape index: {}]   ;;  %s2456_s3 = inlined_call_operand.vmem [shape: f32[8,1], index: 3, kind: output, shape index: {0}]   ;;  %s2457_s4 = inlined_call_operand.hbm [shape: f32[2,8,32], index: 4, kind: output, shape index: {1}]   ;;  %s2458_s5 = inlined_call_operand.hbm [shape: f32[2,8,32], index: 5, kind: output, shape index: {2}]  }
   0x1   :  { %v36_v0 = vld [vmem:[%s2453_s0] sm:$0xff] }
   0x2   :  { %12 = vsyncpa [#allocation5], 0  ;;  %1939 = vtanh.f32 %v36_v0  ;;  %s2119_s20 = smov 64   ;;  %v1664_v2 = vmul.f32 -1.442695, %v36_v0  ;;  %v20_v8 = vld [vmem:[%s2454_s1 + $0x8] sm:$0xff] }
   0x3   :  { %v22_v9 = vld [vmem:[%s2454_s1 + $0x20] sm:$0xff]  ;;  %v21_v12 = vld [vmem:[%s2454_s1 + $0x18] sm:$0xff]  ;;  %v26_v14 = vld [vmem:[%s2454_s1 + $0x50] sm:$0xff]  ;;  %v2120_v15 = vmov 0.0   ;;  %s2121_s12 = smov 96   ;;  %s2122_s13 = smov 32  }
   0x4   :  { %1941 = vpow2.f32 %v1664_v2  ;;  %v19_v10 = vld [vmem:[%s2454_s1] sm:$0xff]  ;;  %v2172_v11 = vpack.c.bf16 %v22_v9, %v20_v8  ;;  %v24_v13 = vld [vmem:[%s2454_s1 + $0x38] sm:$0xff]  ;;  %125 = vmatprep.mubr.f32.mxu0 %v2120_v15  ;;  %v23_v18 = vld [vmem:[%s2454_s1 + $0x30] sm:$0xff]  ;;  %vm58_vm0 = vcmask 261120   ;;  %v2123_v47 = vmov 0.0|0.0  }
   0x5   :  { %v2184_v16 = vpack.c.bf16 %v21_v12, %v19_v10  ;;  %v2186_v17 = vpack.c.bf16 %v26_v14, %v24_v13  ;;  %v25_v19 = vld [vmem:[%s2454_s1 + $0x48] sm:$0xff]  ;;  %v2216_v27 = vld [vmem:[%s2455_s2] ss:$0 sm:$0xff]  ;;  %v27_v45 = vld [vmem:[%s2454_s1 + $0x10] sm:$0xff]  ;;  %1833 = vmatprep.subr.bf16.mxu1 %v2123_v47  ;;  %vm2124_vm1 = vmmov 0  }
   0x6   :  { %1826 = vmatprep.subr.bf16.mxu0 %v2172_v11  ;;  %v2196_v20 = vpack.c.bf16 %v25_v19, %v23_v18  ;;  %v151_v25 = vld [vmem:[%s2453_s0 + $0x8] sm:$0xff]  ;;  %v29_v52 = vld [vmem:[%s2454_s1 + $0x40] sm:$0xff]  ;;  %v30_v53 = vld [vmem:[%s2454_s1 + $0x58] sm:$0xff]  ;;  %1745 = vmatprep.mubr.msk.f32.mxu1 %vm2124_vm1, %v2120_v15 }
   0x7   :  { %1828 = vmatpush1.bf16.msra.mxu0 %v2184_v16  ;;  %v28_v46 = vld [vmem:[%s2454_s1 + $0x28] sm:$0xff]  ;;  %v2240_v55 = vpack.c.bf16 %v30_v53, %v29_v52  ;;  %v362_v2 = vld [vmem:[%s2453_s0 + $0x10] sm:$0xff] }
   0x8   :  { %1830 = vmatprep.subr.bf16.mxu0 %v2186_v17  ;;  %v2229_v48 = vpack.c.bf16 %v28_v46, %v27_v45 }
   0xa   :  { %1835 = vmatpush3.bf16.msra.mxu1 %v2229_v48 }
   0xb   :  { %1832 = vmatpush1.bf16.msra.mxu0 %v2196_v20  ;;  %1836 = vmatprep.subr.bf16.mxu1 %v2123_v47 }
   0xc   :  { %v1940_v1 = vpop.eup %1939  ;;  %1840 = vmatprep.subr.bf16.mxu0 %v2172_v11 }
   0xd   :  { %45 = vrot.lane.b32.xlu0 %v1940_v1, %s2119_s20 }
   0xe   :  { %v1942_v3 = vpop.eup %1941  ;;  %1838 = vmatpush3.bf16.msra.mxu1 %v2240_v55 }
   0xf   :  { %v40_v4 = vadd.f32 1.0, %v1942_v3  ;;  %1847 = vmatprep.subr.bf16.mxu1 %v2123_v47 }
  0x11   :  { %1943 = vrcp.f32 %v40_v4 }
  0x1b   :  { %v1944_v5 = vpop.eup %1943 }
  0x7f   :  { %v46_v6 = vpop.permute.xlu0 %45 }
  0x80   :  { %v48_v7 = vmul.f32 %v1944_v5, %v46_v6 }
  0x82   :  { %1945 = vtanh.f32 %v48_v7 }
  0x8c   :  { %v1946_v21 = vpop.eup %1945 }
  0x8d   :  { %51 = vrot.lane.b32.xlu0 %v1946_v21, %s2121_s12 }
  0x91   :  { %161 = vrot.lane.b32.xlu0 %v48_v7, %s2122_s13 }
  0xff   :  { %v52_v22 = vpop.permute.xlu0 %51 }
 0x100   :  { %v54_v23 = vmul.f32 %v1944_v5, %v52_v22 }
 0x102   :  { %56 = vrot.lane.b32.xlu1 %v54_v23, %s2122_s13 }
 0x103   :  { %v162_v50 = vpop.permute.xlu0 %161 }
 0x174   :  { %v57_v24 = vpop.permute.xlu1 %56 }
 0x175   :  { %1665 = vmatmul.mubr.msk.f32.vlgmr.msra.gmra.mrb[0].mxu0 %vm58_vm0, %v57_v24 }
 0x176   :  { %1842 = vmatpush1.bf16.msra.mxu0 %v2184_v16  ;;  %325 = vmatprep.mubr.f32.mxu0 %v2120_v15 }
 0x177   :  { %1844 = vmatprep.subr.bf16.mxu0 %v2186_v17 }
 0x17a   :  { %1846 = vmatpush1.bf16.msra.mxu0 %v2196_v20 }
 0x17b   :  { %1854 = vmatprep.subr.bf16.mxu0 %v2172_v11 }
 0x248   :  { %v127_v26 = vpop.f32.mrb[0].mxu0 }
 0x249   :  { %v129_v28 = vpop.f32.mrb[1].mxu0  ;;  %v132_v30 = vadd.f32 %v2216_v27, %v127_v26 }
 0x24a   :  { %v152_v29 = vadd.f32 %v151_v25, %v129_v28 }
 0x24b   :  { %v1666_v34 = vmul.f32 -1.442695, %v132_v30 }
 0x24c   :  { %1947 = vtanh.f32 %v152_v29  ;;  %v1667_v33 = vmul.f32 -1.442695, %v152_v29 }
 0x24d   :  { %1949 = vtanh.f32 %v132_v30 }
 0x24e   :  { %1951 = vpow2.f32 %v1667_v33 }
 0x24f   :  { %1953 = vpow2.f32 %v1666_v34 }
 0x256   :  { %v1948_v31 = vpop.eup %1947 }
 0x257   :  { %166 = vrot.lane.b32.xlu1 %v1948_v31, %s2119_s20  ;;  %v1950_v32 = vpop.eup %1949 }
 0x258   :  { %v1952_v35 = vpop.eup %1951 }
 0x259   :  { %v156_v36 = vadd.f32 1.0, %v1952_v35  ;;  %v1954_v37 = vpop.eup %1953 }
 0x25a   :  { %v136_v38 = vadd.f32 1.0, %v1954_v37 }
 0x25b   :  { %141 = vrot.lane.b32.xlu1 %v1950_v32, %s2119_s20  ;;  %1955 = vrcp.f32 %v156_v36 }
 0x25c   :  { %1957 = vrcp.f32 %v136_v38 }
 0x265   :  { %v1956_v39 = vpop.eup %1955 }
 0x266   :  { %v1958_v42 = vpop.eup %1957  ;;  %v164_v51 = vmul.f32 %v1956_v39, %v162_v50 }
 0x2c9   :  { %v167_v40 = vpop.permute.xlu1 %166 }
 0x2ca   :  { %v169_v41 = vmul.f32 %v1956_v39, %v167_v40 }
 0x2cc   :  { %171 = vrot.lane.b32.xlu0 %v169_v41, %s2122_s13 }
 0x2cd   :  { %v142_v43 = vpop.permute.xlu1 %141 }
 0x2ce   :  { %v144_v44 = vmul.f32 %v1958_v42, %v142_v43  ;;  %v565_v43 = vld [vmem:[%s2453_s0 + $0x18] sm:$0xff] }
 0x2d0   :  { %1959 = vtanh.f32 %v144_v44 }
 0x2da   :  { %v1960_v49 = vpop.eup %1959 }
 0x2db   :  { %147 = vrot.lane.b32.xlu1 %v1960_v49, %s2121_s12 }
 0x33e   :  { %v172_v54 = vpop.permute.xlu0 %171 }
 0x33f   :  { %v174_v56 = vadd.f32 %v172_v54, %v164_v51 }
 0x341   :  { %1961 = vtanh.f32 %v174_v56 }
 0x34b   :  { %v1962_v57 = vpop.eup %1961 }
 0x34c   :  { %177 = vrot.lane.b32.xlu0 %v1962_v57, %s2119_s20 }
 0x34d   :  { %v148_v58 = vpop.permute.xlu1 %147 }
 0x34e   :  { %v150_v59 = vmul.f32 %v1958_v42, %v148_v58 }
 0x350   :  { %182 = vrot.lane.b32.xlu1 %v150_v59, %s2122_s13 }
 0x3be   :  { %v178_v60 = vpop.permute.xlu0 %177 }
 0x3bf   :  { %v180_v61 = vmul.f32 %v1956_v39, %v178_v60 }
 0x3c1   :  { %257 = vrot.lane.b32.xlu0 %v180_v61, %s2122_s13 }
 0x3c2   :  { %v183_v62 = vpop.permute.xlu1 %182 }
 0x3c3   :  { %1746 = vmatmul.mubr.msk.f32.vlgmr.msra.gmra.mrb[0].mxu1 %vm58_vm0, %v183_v62 }
 0x3c4   :  { %1849 = vmatpush3.bf16.msra.mxu1 %v2229_v48  ;;  %1756 = vmatprep.mubr.msk.f32.mxu1 %vm2124_vm1, %v2120_v15 }
 0x3c5   :  { %1850 = vmatprep.subr.bf16.mxu1 %v2123_v47 }
 0x3c8   :  { %1852 = vmatpush3.bf16.msra.mxu1 %v2240_v55 }
 0x3c9   :  { %1861 = vmatprep.subr.bf16.mxu1 %v2123_v47 }
 0x433   :  { %v258_v63 = vpop.permute.xlu0 %257 }
 0x434   :  { %1669 = vmatmul.mubr.msk.f32.vlgmr.msra.gmra.mrb[2].mxu0 %vm58_vm0, %v258_v63 }
 0x435   :  { %1856 = vmatpush1.bf16.msra.mxu0 %v2184_v16  ;;  %532 = vmatprep.mubr.f32.mxu0 %v2120_v15 }
 0x436   :  { %1858 = vmatprep.subr.bf16.mxu0 %v2186_v17 }
 0x439   :  { %1860 = vmatpush1.bf16.msra.mxu0 %v2196_v20 }
 0x43a   :  { %1868 = vmatprep.subr.bf16.mxu0 %v2172_v11 }
 0x496   :  { %v252_v0 = vpop.f32.mrb[0].mxu1 }
 0x497   :  { %v1747_v1 = vpop.f32.mrb[1].mxu1 }
 0x507   :  { %v327_v3 = vpop.f32.mrb[2].mxu0 }
 0x508   :  { %v332_v4 = vadd.f32 %v327_v3, %v252_v0  ;;  %v329_v5 = vpop.f32.mrb[3].mxu0 }
 0x509   :  { %v363_v6 = vadd.f32 %v362_v2, %v329_v5 }
 0x50a   :  { %v333_v7 = vadd.f32 %v2216_v27, %v332_v4 }
 0x50b   :  { %1963 = vtanh.f32 %v363_v6  ;;  %v1671_v10 = vmul.f32 -1.442695, %v363_v6 }
 0x50c   :  { %1965 = vtanh.f32 %v333_v7  ;;  %v1670_v12 = vmul.f32 -1.442695, %v333_v7 }
 0x50d   :  { %1967 = vpow2.f32 %v1671_v10 }
 0x50e   :  { %1969 = vpow2.f32 %v1670_v12 }
 0x515   :  { %v1964_v8 = vpop.eup %1963 }
 0x516   :  { %v1966_v9 = vpop.eup %1965  ;;  %373 = vrot.lane.b32.xlu0 %v1964_v8, %s2119_s20 }
 0x517   :  { %347 = vrot.lane.b32.xlu1 %v1966_v9, %s2119_s20  ;;  %v1968_v13 = vpop.eup %1967 }
 0x518   :  { %v1970_v14 = vpop.eup %1969  ;;  %v367_v18 = vadd.f32 1.0, %v1968_v13 }
 0x519   :  { %v337_v19 = vadd.f32 1.0, %v1970_v14 }
 0x51a   :  { %1971 = vrcp.f32 %v367_v18 }
 0x51b   :  { %342 = vrot.lane.b32.xlu1 %v144_v44, %s2122_s13  ;;  %1973 = vrcp.f32 %v337_v19 }
 0x524   :  { %v1972_v21 = vpop.eup %1971 }
 0x525   :  { %v1974_v23 = vpop.eup %1973  ;;  %v371_v29 = vmul.f32 %v1972_v21, %v174_v56 }
 0x588   :  { %v374_v22 = vpop.permute.xlu0 %373 }
 0x589   :  { %v376_v24 = vmul.f32 %v1972_v21, %v374_v22  ;;  %v348_v25 = vpop.permute.xlu1 %347 }
 0x58a   :  { %v350_v26 = vmul.f32 %v1974_v23, %v348_v25 }
 0x58b   :  { %378 = vrot.lane.b32.xlu1 %v376_v24, %s2122_s13 }
 0x58c   :  { %352 = vrot.lane.b32.xlu0 %v350_v26, %s2122_s13 }
 0x58d   :  { %v343_v28 = vpop.permute.xlu1 %342 }
 0x58e   :  { %v345_v30 = vmul.f32 %v1974_v23, %v343_v28 }
 0x5fd   :  { %v379_v31 = vpop.permute.xlu1 %378 }
 0x5fe   :  { %v381_v32 = vadd.f32 %v379_v31, %v371_v29  ;;  %v353_v33 = vpop.permute.xlu0 %352 }
 0x5ff   :  { %v355_v34 = vadd.f32 %v353_v33, %v345_v30 }
 0x600   :  { %1975 = vtanh.f32 %v381_v32 }
 0x601   :  { %1977 = vtanh.f32 %v355_v34 }
 0x60a   :  { %v1976_v35 = vpop.eup %1975 }
 0x60b   :  { %v1978_v36 = vpop.eup %1977  ;;  %384 = vrot.lane.b32.xlu1 %v1976_v35, %s2119_s20 }
 0x60c   :  { %358 = vrot.lane.b32.xlu0 %v1978_v36, %s2119_s20 }
 0x67d   :  { %v385_v37 = vpop.permute.xlu1 %384 }
 0x67e   :  { %v387_v38 = vmul.f32 %v1972_v21, %v385_v37  ;;  %v359_v39 = vpop.permute.xlu0 %358 }
 0x67f   :  { %v361_v40 = vmul.f32 %v1974_v23, %v359_v39  ;;  %v768_v23 = vld [vmem:[%s2453_s0 + $0x20] sm:$0xff] }
 0x680   :  { %464 = vrot.lane.b32.xlu1 %v387_v38, %s2122_s13 }
 0x681   :  { %389 = vrot.lane.b32.xlu0 %v361_v40, %s2122_s13 }
 0x6f2   :  { %v465_v41 = vpop.permute.xlu1 %464 }
 0x6f3   :  { %v390_v42 = vpop.permute.xlu0 %389  ;;  %1673 = vmatmul.mubr.msk.f32.vlgmr.msra.gmra.mrb[4].mxu0 %vm58_vm0, %v465_v41 }
 0x6f4   :  { %1757 = vmatmul.mubr.msk.f32.vlgmr.msra.gmra.mrb[2].mxu1 %vm58_vm0, %v390_v42  ;;  %1870 = vmatpush1.bf16.msra.mxu0 %v2184_v16 }
 0x6f5   :  { %1863 = vmatpush3.bf16.msra.mxu1 %v2229_v48  ;;  %1872 = vmatprep.subr.bf16.mxu0 %v2186_v17 }
 0x6f6   :  { %1864 = vmatprep.subr.bf16.mxu1 %v2123_v47  ;;  %735 = vmatprep.mubr.f32.mxu0 %v2120_v15 }
 0x6f7   :  { %1767 = vmatprep.mubr.msk.f32.mxu1 %vm2124_vm1, %v2120_v15 }
 0x6f8   :  { %1874 = vmatpush1.bf16.msra.mxu0 %v2196_v20 }
 0x6f9   :  { %1866 = vmatpush3.bf16.msra.mxu1 %v2240_v55  ;;  %1882 = vmatprep.subr.bf16.mxu0 %v2172_v11 }
 0x6fa   :  { %1875 = vmatprep.subr.bf16.mxu1 %v2123_v47 }
 0x7c6   :  { %v534_v44 = vpop.f32.mrb[4].mxu0 }
 0x7c7   :  { %v459_v45 = vpop.f32.mrb[2].mxu1  ;;  %v536_v46 = vpop.f32.mrb[5].mxu0 }
 0x7c8   :  { %v539_v49 = vadd.f32 %v534_v44, %v459_v45  ;;  %v566_v50 = vadd.f32 %v565_v43, %v536_v46  ;;  %v1758_v51 = vpop.f32.mrb[3].mxu1 }
 0x7ca   :  { %v540_v52 = vadd.f32 %v2216_v27, %v539_v49  ;;  %1979 = vtanh.f32 %v566_v50  ;;  %v1675_v56 = vmul.f32 -1.442695, %v566_v50 }
 0x7cc   :  { %1981 = vtanh.f32 %v540_v52  ;;  %v1674_v57 = vmul.f32 -1.442695, %v540_v52 }
 0x7cd   :  { %1983 = vpow2.f32 %v1675_v56 }
 0x7ce   :  { %1985 = vpow2.f32 %v1674_v57 }
 0x7d4   :  { %v1980_v53 = vpop.eup %1979 }
 0x7d5   :  { %576 = vrot.lane.b32.xlu1 %v1980_v53, %s2119_s20 }
 0x7d6   :  { %v1982_v54 = vpop.eup %1981 }
 0x7d7   :  { %550 = vrot.lane.b32.xlu0 %v1982_v54, %s2119_s20  ;;  %v1984_v58 = vpop.eup %1983 }
 0x7d8   :  { %v1986_v59 = vpop.eup %1985  ;;  %v570_v60 = vadd.f32 1.0, %v1984_v58 }
 0x7d9   :  { %v544_v61 = vadd.f32 1.0, %v1986_v59 }
 0x7da   :  { %1987 = vrcp.f32 %v570_v60 }
 0x7db   :  { %1989 = vrcp.f32 %v544_v61 }
 0x7e4   :  { %v1988_v62 = vpop.eup %1987 }
 0x7e5   :  { %v1990_v1 = vpop.eup %1989  ;;  %v574_v4 = vmul.f32 %v1988_v62, %v381_v32 }
 0x7e6   :  { %v548_v7 = vmul.f32 %v1990_v1, %v355_v34 }
 0x847   :  { %v577_v63 = vpop.permute.xlu1 %576 }
 0x848   :  { %v579_v0 = vmul.f32 %v1988_v62, %v577_v63  ;;  %v971_v63 = vld [vmem:[%s2453_s0 + $0x28] sm:$0xff] }
 0x849   :  { %v551_v2 = vpop.permute.xlu0 %550 }
 0x84a   :  { %v553_v3 = vmul.f32 %v1990_v1, %v551_v2  ;;  %581 = vrot.lane.b32.xlu1 %v579_v0, %s2122_s13 }
 0x84c   :  { %555 = vrot.lane.b32.xlu0 %v553_v3, %s2122_s13 }
 0x8bc   :  { %v582_v5 = vpop.permute.xlu1 %581 }
 0x8bd   :  { %v584_v6 = vadd.f32 %v582_v5, %v574_v4 }
 0x8be   :  { %v556_v8 = vpop.permute.xlu0 %555 }
 0x8bf   :  { %1991 = vtanh.f32 %v584_v6  ;;  %v558_v9 = vadd.f32 %v556_v8, %v548_v7 }
 0x8c1   :  { %1993 = vtanh.f32 %v558_v9 }
 0x8c9   :  { %v1992_v10 = vpop.eup %1991 }
 0x8ca   :  { %587 = vrot.lane.b32.xlu1 %v1992_v10, %s2119_s20 }
 0x8cb   :  { %v1994_v12 = vpop.eup %1993 }
 0x8cc   :  { %561 = vrot.lane.b32.xlu0 %v1994_v12, %s2119_s20 }
 0x93c   :  { %v588_v13 = vpop.permute.xlu1 %587 }
 0x93d   :  { %v590_v14 = vmul.f32 %v1988_v62, %v588_v13 }
 0x93e   :  { %v562_v18 = vpop.permute.xlu0 %561 }
 0x93f   :  { %v564_v19 = vmul.f32 %v1990_v1, %v562_v18  ;;  %667 = vrot.lane.b32.xlu1 %v590_v14, %s2122_s13 }
 0x941   :  { %592 = vrot.lane.b32.xlu0 %v564_v19, %s2122_s13 }
 0x9b1   :  { %v668_v21 = vpop.permute.xlu1 %667 }
 0x9b2   :  { %1677 = vmatmul.mubr.msk.f32.vlgmr.msra.gmra.mrb[6].mxu0 %vm58_vm0, %v668_v21 }
 0x9b3   :  { %v593_v22 = vpop.permute.xlu0 %592  ;;  %1884 = vmatpush1.bf16.msra.mxu0 %v2184_v16  ;;  %938 = vmatprep.mubr.f32.mxu0 %v2120_v15 }
 0x9b4   :  { %1768 = vmatmul.mubr.msk.f32.vlgmr.msra.gmra.mrb[4].mxu1 %vm58_vm0, %v593_v22  ;;  %1886 = vmatprep.subr.bf16.mxu0 %v2186_v17 }
 0x9b5   :  { %1877 = vmatpush3.bf16.msra.mxu1 %v2229_v48  ;;  %1778 = vmatprep.mubr.msk.f32.mxu1 %vm2124_vm1, %v2120_v15 }
 0x9b6   :  { %1878 = vmatprep.subr.bf16.mxu1 %v2123_v47 }
 0x9b7   :  { %1888 = vmatpush1.bf16.msra.mxu0 %v2196_v20 }
 0x9b8   :  { %1896 = vmatprep.subr.bf16.mxu0 %v2172_v11 }
 0x9b9   :  { %1880 = vmatpush3.bf16.msra.mxu1 %v2240_v55 }
 0x9ba   :  { %1889 = vmatprep.subr.bf16.mxu1 %v2123_v47 }
 0xa85   :  { %v737_v24 = vpop.f32.mrb[6].mxu0 }
 0xa86   :  { %v739_v25 = vpop.f32.mrb[7].mxu0 }
 0xa87   :  { %v769_v26 = vadd.f32 %v768_v23, %v739_v25  ;;  %v662_v28 = vpop.f32.mrb[4].mxu1 }
 0xa88   :  { %v742_v29 = vadd.f32 %v737_v24, %v662_v28  ;;  %v1769_v30 = vpop.f32.mrb[5].mxu1 }
 0xa89   :  { %1995 = vtanh.f32 %v769_v26  ;;  %v1679_v34 = vmul.f32 -1.442695, %v769_v26 }
 0xa8a   :  { %v743_v31 = vadd.f32 %v2216_v27, %v742_v29 }
 0xa8c   :  { %1997 = vtanh.f32 %v743_v31  ;;  %v1678_v35 = vmul.f32 -1.442695, %v743_v31 }
 0xa8d   :  { %1999 = vpow2.f32 %v1679_v34 }
 0xa8e   :  { %2001 = vpow2.f32 %v1678_v35 }
 0xa93   :  { %v1996_v32 = vpop.eup %1995 }
 0xa94   :  { %779 = vrot.lane.b32.xlu1 %v1996_v32, %s2119_s20 }
 0xa96   :  { %v1998_v33 = vpop.eup %1997 }
 0xa97   :  { %753 = vrot.lane.b32.xlu0 %v1998_v33, %s2119_s20  ;;  %v2000_v36 = vpop.eup %1999 }
 0xa98   :  { %v2002_v37 = vpop.eup %2001  ;;  %v773_v38 = vadd.f32 1.0, %v2000_v36 }
 0xa99   :  { %v747_v39 = vadd.f32 1.0, %v2002_v37 }
 0xa9a   :  { %2003 = vrcp.f32 %v773_v38 }
 0xa9b   :  { %2005 = vrcp.f32 %v747_v39 }
 0xaa4   :  { %v2004_v40 = vpop.eup %2003 }
 0xaa5   :  { %v2006_v43 = vpop.eup %2005  ;;  %v777_v46 = vmul.f32 %v2004_v40, %v584_v6 }
 0xaa6   :  { %v751_v51 = vmul.f32 %v2006_v43, %v558_v9 }
 0xb06   :  { %v780_v41 = vpop.permute.xlu1 %779 }
 0xb07   :  { %v782_v42 = vmul.f32 %v2004_v40, %v780_v41 }
 0xb09   :  { %v754_v44 = vpop.permute.xlu0 %753  ;;  %784 = vrot.lane.b32.xlu1 %v782_v42, %s2122_s13 }
 0xb0a   :  { %v756_v45 = vmul.f32 %v2006_v43, %v754_v44 }
 0xb0c   :  { %758 = vrot.lane.b32.xlu0 %v756_v45, %s2122_s13 }
 0xb7b   :  { %v785_v49 = vpop.permute.xlu1 %784 }
 0xb7c   :  { %v787_v50 = vadd.f32 %v785_v49, %v777_v46 }
 0xb7e   :  { %2007 = vtanh.f32 %v787_v50  ;;  %v759_v52 = vpop.permute.xlu0 %758 }
 0xb7f   :  { %v761_v53 = vadd.f32 %v759_v52, %v751_v51 }
 0xb81   :  { %2009 = vtanh.f32 %v761_v53 }
 0xb88   :  { %v2008_v54 = vpop.eup %2007 }
 0xb89   :  { %790 = vrot.lane.b32.xlu1 %v2008_v54, %s2119_s20 }
 0xb8b   :  { %v2010_v56 = vpop.eup %2009 }
 0xb8c   :  { %764 = vrot.lane.b32.xlu0 %v2010_v56, %s2119_s20 }
 0xbfb   :  { %v791_v57 = vpop.permute.xlu1 %790 }
 0xbfc   :  { %v793_v58 = vmul.f32 %v2004_v40, %v791_v57 }
 0xbfe   :  { %v765_v59 = vpop.permute.xlu0 %764  ;;  %870 = vrot.lane.b32.xlu1 %v793_v58, %s2122_s13 }
 0xbff   :  { %v767_v60 = vmul.f32 %v2006_v43, %v765_v59 }
 0xc01   :  { %795 = vrot.lane.b32.xlu0 %v767_v60, %s2122_s13 }
 0xc70   :  { %v871_v61 = vpop.permute.xlu1 %870 }
 0xc71   :  { %1681 = vmatmul.mubr.msk.f32.vlgmr.msra.gmra.mrb[8].mxu0 %vm58_vm0, %v871_v61 }
 0xc72   :  { %1898 = vmatpush1.bf16.msra.mxu0 %v2184_v16  ;;  %1141 = vmatprep.mubr.f32.mxu0 %v2120_v15 }
 0xc73   :  { %v796_v62 = vpop.permute.xlu0 %795  ;;  %1900 = vmatprep.subr.bf16.mxu0 %v2186_v17 }
 0xc74   :  { %1779 = vmatmul.mubr.msk.f32.vlgmr.msra.gmra.mrb[6].mxu1 %vm58_vm0, %v796_v62 }
 0xc75   :  { %1891 = vmatpush3.bf16.msra.mxu1 %v2229_v48  ;;  %1789 = vmatprep.mubr.msk.f32.mxu1 %vm2124_vm1, %v2120_v15 }
 0xc76   :  { %1902 = vmatpush1.bf16.msra.mxu0 %v2196_v20  ;;  %1892 = vmatprep.subr.bf16.mxu1 %v2123_v47 }
 0xc77   :  { %1910 = vmatprep.subr.bf16.mxu0 %v2172_v11 }
 0xc79   :  { %1894 = vmatpush3.bf16.msra.mxu1 %v2240_v55 }
 0xc7a   :  { %1903 = vmatprep.subr.bf16.mxu1 %v2123_v47 }
 0xd44   :  { %v940_v0 = vpop.f32.mrb[8].mxu0 }
 0xd45   :  { %v942_v1 = vpop.f32.mrb[9].mxu0 }
 0xd46   :  { %v972_v2 = vadd.f32 %v971_v63, %v942_v1 }
 0xd47   :  { %v865_v3 = vpop.f32.mrb[6].mxu1 }
 0xd48   :  { %2011 = vtanh.f32 %v972_v2  ;;  %v945_v4 = vadd.f32 %v940_v0, %v865_v3  ;;  %v1780_v5 = vpop.f32.mrb[7].mxu1  ;;  %v1683_v8 = vmul.f32 -1.442695, %v972_v2 }
 0xd4a   :  { %v946_v6 = vadd.f32 %v2216_v27, %v945_v4 }
 0xd4c   :  { %2013 = vtanh.f32 %v946_v6  ;;  %v1682_v9 = vmul.f32 -1.442695, %v946_v6 }
 0xd4d   :  { %2015 = vpow2.f32 %v1683_v8 }
 0xd4e   :  { %2017 = vpow2.f32 %v1682_v9 }
 0xd52   :  { %v2012_v7 = vpop.eup %2011 }
 0xd53   :  { %982 = vrot.lane.b32.xlu1 %v2012_v7, %s2119_s20 }
 0xd56   :  { %v2014_v11 = vpop.eup %2013 }
 0xd57   :  { %956 = vrot.lane.b32.xlu0 %v2014_v11, %s2119_s20  ;;  %v2016_v10 = vpop.eup %2015 }
 0xd58   :  { %v976_v12 = vadd.f32 1.0, %v2016_v10  ;;  %v2018_v13 = vpop.eup %2017 }
 0xd59   :  { %v950_v14 = vadd.f32 1.0, %v2018_v13 }
 0xd5a   :  { %2019 = vrcp.f32 %v976_v12 }
 0xd5b   :  { %2021 = vrcp.f32 %v950_v14 }
 0xd64   :  { %v2020_v18 = vpop.eup %2019 }
 0xd65   :  { %v2022_v22 = vpop.eup %2021  ;;  %v980_v25 = vmul.f32 %v2020_v18, %v787_v50 }
 0xd66   :  { %v954_v29 = vmul.f32 %v2022_v22, %v761_v53 }
 0xdc5   :  { %v983_v19 = vpop.permute.xlu1 %982 }
 0xdc6   :  { %v985_v21 = vmul.f32 %v2020_v18, %v983_v19 }
 0xdc8   :  { %987 = vrot.lane.b32.xlu1 %v985_v21, %s2122_s13 }
 0xdc9   :  { %v957_v23 = vpop.permute.xlu0 %956 }
 0xdca   :  { %v959_v24 = vmul.f32 %v2022_v22, %v957_v23 }
 0xdcc   :  { %961 = vrot.lane.b32.xlu0 %v959_v24, %s2122_s13 }
 0xe3a   :  { %v988_v26 = vpop.permute.xlu1 %987 }
 0xe3b   :  { %v990_v28 = vadd.f32 %v988_v26, %v980_v25 }
 0xe3d   :  { %2023 = vtanh.f32 %v990_v28 }
 0xe3e   :  { %v962_v30 = vpop.permute.xlu0 %961 }
 0xe3f   :  { %v964_v31 = vadd.f32 %v962_v30, %v954_v29 }
 0xe41   :  { %2025 = vtanh.f32 %v964_v31 }
 0xe47   :  { %v2024_v32 = vpop.eup %2023 }
 0xe48   :  { %993 = vrot.lane.b32.xlu1 %v2024_v32, %s2119_s20 }
 0xe4b   :  { %v2026_v33 = vpop.eup %2025 }
 0xe4c   :  { %967 = vrot.lane.b32.xlu0 %v2026_v33, %s2119_s20 }
 0xeba   :  { %v994_v34 = vpop.permute.xlu1 %993 }
 0xebb   :  { %v996_v35 = vmul.f32 %v2020_v18, %v994_v34 }
 0xebd   :  { %1073 = vrot.lane.b32.xlu1 %v996_v35, %s2122_s13 }
 0xebe   :  { %v968_v36 = vpop.permute.xlu0 %967 }
 0xebf   :  { %v970_v37 = vmul.f32 %v2022_v22, %v968_v36 }
 0xec1   :  { %998 = vrot.lane.b32.xlu0 %v970_v37, %s2122_s13 }
 0xf2f   :  { %v1074_v38 = vpop.permute.xlu1 %1073 }
 0xf30   :  { %1685 = vmatmul.mubr.msk.f32.vlgmr.msra.gmra.mrb[10].mxu0 %vm58_vm0, %v1074_v38 }
 0xf31   :  { %1912 = vmatpush1.bf16.msra.mxu0 %v2184_v16  ;;  %1344 = vmatprep.mubr.f32.mxu0 %v2120_v15 }
 0xf32   :  { %1914 = vmatprep.subr.bf16.mxu0 %v2186_v17  ;;  %v1174_v17 = vld [vmem:[%s2453_s0 + $0x30] sm:$0xff] }
 0xf33   :  { %v999_v39 = vpop.permute.xlu0 %998 }
 0xf34   :  { %1790 = vmatmul.mubr.msk.f32.vlgmr.msra.gmra.mrb[8].mxu1 %vm58_vm0, %v999_v39 }
 0xf35   :  { %1916 = vmatpush1.bf16.msra.mxu0 %v2196_v20  ;;  %1905 = vmatpush3.bf16.msra.mxu1 %v2229_v48 }
 0xf36   :  { %1906 = vmatprep.subr.bf16.mxu1 %v2123_v47  ;;  %1800 = vmatprep.mubr.msk.f32.mxu1 %vm2124_vm1, %v2120_v15 }
 0xf37   :  { %1923 = vmatprep.subr.bf16.mxu0 %v2123_v47 }
 0xf39   :  { %1908 = vmatpush3.bf16.msra.mxu1 %v2240_v55 }
 0xf3a   :  { %1917 = vmatprep.subr.bf16.mxu1 %v2123_v47 }
0x1003   :  { %v1143_v40 = vpop.f32.mrb[10].mxu0 }
0x1004   :  { %v1145_v41 = vpop.f32.mrb[11].mxu0 }
0x1005   :  { %v1175_v42 = vadd.f32 %v1174_v17, %v1145_v41 }
0x1007   :  { %2027 = vtanh.f32 %v1175_v42  ;;  %v1068_v43 = vpop.f32.mrb[8].mxu1  ;;  %v1687_v51 = vmul.f32 -1.442695, %v1175_v42 }
0x1008   :  { %v1148_v44 = vadd.f32 %v1143_v40, %v1068_v43  ;;  %v1791_v45 = vpop.f32.mrb[9].mxu1 }
0x100a   :  { %v1149_v46 = vadd.f32 %v2216_v27, %v1148_v44 }
0x100c   :  { %2029 = vtanh.f32 %v1149_v46  ;;  %v1686_v52 = vmul.f32 -1.442695, %v1149_v46 }
0x100d   :  { %2031 = vpow2.f32 %v1687_v51 }
0x100e   :  { %2033 = vpow2.f32 %v1686_v52 }
0x1011   :  { %v2028_v49 = vpop.eup %2027 }
0x1012   :  { %1185 = vrot.lane.b32.xlu1 %v2028_v49, %s2119_s20 }
0x1016   :  { %v2030_v50 = vpop.eup %2029 }
0x1017   :  { %1159 = vrot.lane.b32.xlu0 %v2030_v50, %s2119_s20  ;;  %v2032_v53 = vpop.eup %2031 }
0x1018   :  { %v1179_v54 = vadd.f32 1.0, %v2032_v53  ;;  %v2034_v56 = vpop.eup %2033 }
0x1019   :  { %v1153_v57 = vadd.f32 1.0, %v2034_v56 }
0x101a   :  { %2035 = vrcp.f32 %v1179_v54 }
0x101b   :  { %2037 = vrcp.f32 %v1153_v57 }
0x1024   :  { %v2036_v58 = vpop.eup %2035 }
0x1025   :  { %v2038_v61 = vpop.eup %2037  ;;  %v1183_v0 = vmul.f32 %v2036_v58, %v990_v28 }
0x1026   :  { %v1157_v3 = vmul.f32 %v2038_v61, %v964_v31 }
0x1084   :  { %v1186_v59 = vpop.permute.xlu1 %1185 }
0x1085   :  { %v1188_v60 = vmul.f32 %v2036_v58, %v1186_v59 }
0x1087   :  { %1190 = vrot.lane.b32.xlu1 %v1188_v60, %s2122_s13 }
0x1089   :  { %v1160_v62 = vpop.permute.xlu0 %1159 }
0x108a   :  { %v1162_v63 = vmul.f32 %v2038_v61, %v1160_v62 }
0x108c   :  { %1164 = vrot.lane.b32.xlu0 %v1162_v63, %s2122_s13 }
0x10f9   :  { %v1191_v1 = vpop.permute.xlu1 %1190 }
0x10fa   :  { %v1193_v2 = vadd.f32 %v1191_v1, %v1183_v0  ;;  %v1695_v0 = vld [vmem:[%s2455_s2 + $0x1] ss:$0 sm:$0xff]  ;;  %s2125_s2 = smov [#allocation2]  }
0x10fc   :  { %2039 = vtanh.f32 %v1193_v2 }
0x10fe   :  { %v1165_v4 = vpop.permute.xlu0 %1164 }
0x10ff   :  { %v1167_v5 = vadd.f32 %v1165_v4, %v1157_v3 }
0x1101   :  { %2041 = vtanh.f32 %v1167_v5 }
0x1106   :  { %v2040_v6 = vpop.eup %2039 }
0x1107   :  { %1196 = vrot.lane.b32.xlu1 %v2040_v6, %s2119_s20 }
0x110b   :  { %v2042_v7 = vpop.eup %2041 }
0x110c   :  { %1170 = vrot.lane.b32.xlu0 %v2042_v7, %s2119_s20 }
0x1179   :  { %v1197_v11 = vpop.permute.xlu1 %1196 }
0x117a   :  { %v1199_v8 = vmul.f32 %v2036_v58, %v1197_v11 }
0x117c   :  { %1276 = vrot.lane.b32.xlu1 %v1199_v8, %s2122_s13 }
0x117e   :  { %v1171_v9 = vpop.permute.xlu0 %1170 }
0x117f   :  { %v1173_v10 = vmul.f32 %v2038_v61, %v1171_v9 }
0x1181   :  { %1201 = vrot.lane.b32.xlu0 %v1173_v10, %s2122_s13 }
0x11ee   :  { %v1277_v12 = vpop.permute.xlu1 %1276 }
0x11ef   :  { %1689 = vmatmul.mubr.msk.f32.vlgmr.msra.gmra.mrb[12].mxu0 %vm58_vm0, %v1277_v12 }
0x11f0   :  { %1925 = vmatpush3.bf16.msra.mxu0 %v2184_v16  ;;  %1822 = vmatprep.mubr.msk.f32.mxu0 %vm2124_vm1, %v2120_v15  ;;  %v1377_v16 = vld [vmem:[%s2453_s0 + $0x38] sm:$0xff] }
0x11f1   :  { %1926 = vmatprep.subr.bf16.mxu0 %v2123_v47 }
0x11f3   :  { %v1202_v13 = vpop.permute.xlu0 %1201 }
0x11f4   :  { %1801 = vmatmul.mubr.msk.f32.vlgmr.msra.gmra.mrb[10].mxu1 %vm58_vm0, %v1202_v13  ;;  %1928 = vmatpush3.bf16.msra.mxu0 %v2196_v20 }
0x11f5   :  { %1919 = vmatpush3.bf16.msra.mxu1 %v2229_v48  ;;  %1811 = vmatprep.mubr.msk.f32.mxu1 %vm2124_vm1, %v2120_v15 }
0x11f6   :  { %1920 = vmatprep.subr.bf16.mxu1 %v2123_v47 }
0x11f9   :  { %1922 = vmatpush3.bf16.msra.mxu1 %v2240_v55 }
0x12c2   :  { %v1346_v14 = vpop.f32.mrb[12].mxu0 }
0x12c3   :  { %v1348_v18 = vpop.f32.mrb[13].mxu0 }
0x12c4   :  { %v1378_v19 = vadd.f32 %v1377_v16, %v1348_v18 }
0x12c6   :  { %2043 = vtanh.f32 %v1378_v19  ;;  %v1691_v47 = vmul.f32 -1.442695, %v1378_v19 }
0x12c7   :  { %v1271_v21 = vpop.f32.mrb[10].mxu1 }
0x12c8   :  { %v1351_v22 = vadd.f32 %v1346_v14, %v1271_v21  ;;  %v1802_v20 = vpop.f32.mrb[11].mxu1 }
0x12ca   :  { %v1352_v48 = vadd.f32 %v2216_v27, %v1351_v22 }
0x12cc   :  { %2045 = vtanh.f32 %v1352_v48  ;;  %v1690_v55 = vmul.f32 -1.442695, %v1352_v48 }
0x12cd   :  { %2047 = vpow2.f32 %v1691_v47 }
0x12ce   :  { %2049 = vpow2.f32 %v1690_v55 }
0x12d0   :  { %v2044_v23 = vpop.eup %2043 }
0x12d1   :  { %1388 = vrot.lane.b32.xlu1 %v2044_v23, %s2119_s20 }
0x12d6   :  { %v2046_v15 = vpop.eup %2045 }
0x12d7   :  { %1362 = vrot.lane.b32.xlu0 %v2046_v15, %s2119_s20  ;;  %v2048_v24 = vpop.eup %2047 }
0x12d8   :  { %v1382_v25 = vadd.f32 1.0, %v2048_v24  ;;  %v2050_v26 = vpop.eup %2049 }
0x12d9   :  { %v1356_v28 = vadd.f32 1.0, %v2050_v26 }
0x12da   :  { %2051 = vrcp.f32 %v1382_v25 }
0x12db   :  { %2053 = vrcp.f32 %v1356_v28 }
0x12e4   :  { %v2052_v29 = vpop.eup %2051 }
0x12e5   :  { %v2054_v32 = vpop.eup %2053  ;;  %v1386_v35 = vmul.f32 %v2052_v29, %v1193_v2 }
0x12e6   :  { %v1360_v38 = vmul.f32 %v2054_v32, %v1167_v5 }
0x1343   :  { %v1389_v30 = vpop.permute.xlu1 %1388 }
0x1344   :  { %v1391_v31 = vmul.f32 %v2052_v29, %v1389_v30 }
0x1346   :  { %1393 = vrot.lane.b32.xlu1 %v1391_v31, %s2122_s13 }
0x1349   :  { %v1363_v33 = vpop.permute.xlu0 %1362 }
0x134a   :  { %v1365_v34 = vmul.f32 %v2054_v32, %v1363_v33 }
0x134c   :  { %1367 = vrot.lane.b32.xlu0 %v1365_v34, %s2122_s13 }
0x13b8   :  { %v1394_v36 = vpop.permute.xlu1 %1393 }
0x13b9   :  { %v1396_v37 = vadd.f32 %v1394_v36, %v1386_v35 }
0x13bb   :  { %2055 = vtanh.f32 %v1396_v37 }
0x13be   :  { %v1368_v39 = vpop.permute.xlu0 %1367 }
0x13bf   :  { %v1370_v17 = vadd.f32 %v1368_v39, %v1360_v38 }
0x13c1   :  { %2057 = vtanh.f32 %v1370_v17 }
0x13c5   :  { %v2056_v40 = vpop.eup %2055 }
0x13c6   :  { %1399 = vrot.lane.b32.xlu1 %v2056_v40, %s2119_s20 }
0x13cb   :  { %v2058_v41 = vpop.eup %2057 }
0x13cc   :  { %1373 = vrot.lane.b32.xlu0 %v2058_v41, %s2119_s20 }
0x1438   :  { %v1400_v42 = vpop.permute.xlu1 %1399 }
0x1439   :  { %v1402_v43 = vmul.f32 %v2052_v29, %v1400_v42 }
0x143b   :  { %1479 = vrot.lane.b32.xlu1 %v1402_v43, %s2122_s13 }
0x143e   :  { %v1374_v44 = vpop.permute.xlu0 %1373 }
0x143f   :  { %v1376_v45 = vmul.f32 %v2054_v32, %v1374_v44 }
0x1441   :  { %1404 = vrot.lane.b32.xlu0 %v1376_v45, %s2122_s13 }
0x14ad   :  { %v1480_v46 = vpop.permute.xlu1 %1479 }
0x14ae   :  { %1579 = vst.msk [vmem:[#allocation2] sm:$0xff] %vm58_vm0, %v1480_v46  ;;  %1823 = vmatmul.mubr.msk.f32.vlgmr.msra.gmra.mrb[14].mxu0 %vm58_vm0, %v1480_v46 }
0x14b3   :  { %v1405_v49 = vpop.permute.xlu0 %1404 }
0x14b4   :  { %1812 = vmatmul.mubr.msk.f32.vlgmr.msra.gmra.mrb[12].mxu1 %vm58_vm0, %v1405_v49 }
0x1581   :  { %v1549_v50 = vpop.f32.mrb[14].mxu0 }
0x1582   :  { %v1824_v51 = vpop.f32.mrb[15].mxu0 }
0x1587   :  { %v1474_v52 = vpop.f32.mrb[12].mxu1 }
0x1588   :  { %v1550_v53 = vadd.f32 %v1549_v50, %v1474_v52  ;;  %v1813_v54 = vpop.f32.mrb[13].mxu1 }
0x158a   :  { %v1553_v56 = vadd.f32 %v2216_v27, %v1550_v53 }
0x158c   :  { %2059 = vtanh.f32 %v1553_v56  ;;  %v1694_v58 = vmul.f32 -1.442695, %v1553_v56 }
0x158e   :  { %2061 = vpow2.f32 %v1694_v58 }
0x1596   :  { %v2060_v57 = vpop.eup %2059 }
0x1597   :  { %1563 = vrot.lane.b32.xlu0 %v2060_v57, %s2119_s20 }
0x1598   :  { %v2062_v59 = vpop.eup %2061 }
0x1599   :  { %v1557_v60 = vadd.f32 1.0, %v2062_v59 }
0x159b   :  { %2063 = vrcp.f32 %v1557_v60 }
0x15a5   :  { %v2064_v61 = vpop.eup %2063 }
0x15a6   :  { %v1561_v27 = vmul.f32 %v2064_v61, %v1370_v17 }
0x1609   :  { %v1564_v62 = vpop.permute.xlu0 %1563 }
0x160a   :  { %v1566_v63 = vmul.f32 %v2064_v61, %v1564_v62 }
0x160c   :  { %1568 = vrot.lane.b32.xlu1 %v1566_v63, %s2122_s13 }
0x1610   :  { %1603 = vrot.lane.b32.xlu1 %v1695_v0, %s2121_s12 }
0x167e   :  { %v1569_v1 = vpop.permute.xlu1 %1568 }
0x167f   :  { %v1571_v2 = vadd.f32 %v1569_v1, %v1561_v27 }
0x1681   :  { %2065 = vtanh.f32 %v1571_v2 }
0x1682   :  { %v1604_v5 = vpop.permute.xlu1 %1603 }
0x168b   :  { %v2066_v3 = vpop.eup %2065 }
0x168c   :  { %1574 = vrot.lane.b32.xlu0 %v2066_v3, %s2119_s20  ;;  %s1634_s20 = sshll.u32 %s2125_s2, 4  ;;  %s1635_s20 = int_to_ptr.vmem [resolvable:$true] %s1634_s20 }
0x168d   :  { %s2071_s17 = scalar_lea.vmem %s1635_s20, 256  ;;  %p2076_p1 = scmp.lt.s32.totalorder %s1635_s20, %s1635_s20 }
0x168e   :  { %p2072_p0 = scmp.ne.s32.totalorder %s1635_s20, %s2071_s17  ;;  %p2077_p2 = scmp.lt.s32.totalorder %s2071_s17, %s2071_s17 }
0x1690   :  { %p2078_p3 = por %p2077_p2, %p2076_p1 }
0x1692   :  { %p2079_p4 = pnand %p2078_p3, %p2072_p0 }
0x16fe   :  { %v1575_v4 = vpop.permute.xlu0 %1574 }
0x16ff   :  { %v1577_v6 = vmul.f32 %v2064_v61, %v1575_v4 }
0x1701   :  { %v1606_v7 = vmul.f32 %v1604_v5, %v1577_v6 }
0x1703   :  { %1608 = vrot.lane.b32.xlu0 %v1606_v7, %s2122_s13 }
0x1707   :  { %1581 = vrot.lane.b32.xlu0 %v1577_v6, %s2122_s13  ;;  %s2126_s13 = smov [#allocation4]  }
0x1708   :  { %s1646_s16 = sshll.u32 %s2126_s13, 4  ;;  %s2418_s16 = int_to_ptr.vmem [resolvable:$true] %s1646_s16 }
0x170b   :  { %1587 = vrot.lane.b32.xlu0 %v1396_v37, %s2121_s12 }
0x170f   :  { %1592 = vrot.lane.b32.xlu0 %v1571_v2, %s2121_s12 }
0x1775   :  { %v1609_v11 = vpop.permute.xlu0 %1608 }
0x1776   :  { %v1611_v8 = vsel %vm58_vm0, %v1609_v11, 0.0 }
0x1777   :  { %1612 = vadd.xlane.f32.xlu1 %v1611_v8 }
0x1779   :  { %v1582_v9 = vpop.permute.xlu0 %1581 }
0x177a   :  { %1585 = vst.msk [vmem:[#allocation2 + $0x8] sm:$0xff] %vm58_vm0, %v1582_v9 }
0x177d   :  { %v1588_v10 = vpop.permute.xlu0 %1587 }
0x177e   :  { %1590 = vst.msk [vmem:[#allocation4] sm:$0xff] %vm58_vm0, %v1588_v10 }
0x1781   :  { %v1593_v12 = vpop.permute.xlu0 %1592 }
0x1782   :  { %1596 = vst.msk [vmem:[#allocation4 + $0x8] sm:$0xff] %vm58_vm0, %v1593_v12 }
0x1804   :  { %v1613_v13 = vpop.xlane.xlu1 %1612 }
0x1805   :  { %v1614_v16 = vadd.f32 %v1695_v0, %v1613_v13 }
0x1807   :  { %v1696_v14 = vmul.f32 -1.442695, %v1614_v16 }
0x1809   :  { %2067 = vpow2.f32 %v1696_v14 }
0x1813   :  { %v2068_v18 = vpop.eup %2067 }
0x1814   :  { %v1618_v19 = vadd.f32 1.0, %v2068_v18 }
0x1816   :  { %2069 = vrcp.f32 %v1618_v19 }
0x1817   :  { %2082 = shalt.err (!%p2079_p4)
}
0x1818   :  { %s2083_s21 = scalar_lea.hbm %s2457_s4, 256 }
0x1819   :  { %p2084_p5 = scmp.ne.s32.totalorder %s2457_s4, %s2083_s21  ;;  %p2087_p6 = scmp.lt.u32.totalorder %s2083_s21, %s2457_s4 }
0x181b   :  { %p2089_p7 = pnand %p2087_p6, %p2084_p5 }
0x181d   :  { %2092 = shalt.err (!%p2089_p7)
}
0x181e   :  { %s2127_s26 = smov 128   ;;  %s2128_s1 = smov 8  }
0x181f   :  { %1640 = dma.vmem_to_hbm [thread:$0]  %s1635_s20, 256, %s2457_s4, [#allocation3], %s2127_s26, %s2127_s26, %s2128_s1  }
0x1820   :  { %s2093_s29 = scalar_lea.vmem %s2418_s16, 256  ;;  %p2098_p9 = scmp.lt.s32.totalorder %s2418_s16, %s2418_s16 }
0x1821   :  { %p2094_p8 = scmp.ne.s32.totalorder %s2418_s16, %s2093_s29  ;;  %p2099_p10 = scmp.lt.s32.totalorder %s2093_s29, %s2093_s29 }
0x1823   :  { %p2100_p11 = por %p2099_p10, %p2098_p9 }
0x1825   :  { %p2101_p12 = pnand %p2100_p11, %p2094_p8 }
0x1827   :  { %2104 = shalt.err (!%p2101_p12)
}
0x1828   :  { %s2105_s7 = scalar_lea.hbm %s2458_s5, 256 }
0x1829   :  { %p2106_p13 = scmp.ne.s32.totalorder %s2458_s5, %s2105_s7  ;;  %p2109_p0 = scmp.lt.u32.totalorder %s2105_s7, %s2458_s5 }
0x182b   :  { %p2111_p1 = pnand %p2109_p0, %p2106_p13 }
0x182d   :  { %2114 = shalt.err (!%p2111_p1)
}
0x182e   :  { %1652 = dma.vmem_to_hbm [thread:$0]  %s2418_s16, 256, %s2458_s5, [#allocation5], %s2127_s26, %s2127_s26, %s2128_s1   ;;  %v2070_v21 = vpop.eup %2069  ;;  %vm1625_vm2 = vcmask 7168  }
0x182f   :  { %1622 = vrot.lane.b32.xlu0 %v2070_v21, %s2121_s12 }
0x18a1   :  { %v1623_v22 = vpop.permute.xlu0 %1622 }
0x18a2   :  { %1626 = vst.msk [vmem:[%s2456_s3] sm:$0xff] %vm1625_vm2, %v1623_v22 }
0x18a3   :  { %2115 = dma.done.wait [#allocation3], 256  }
0x18a4   :  { %2116 = vsyncadd [#allocation3], 4294967040 }
0x18a5   :  { %2117 = dma.done.wait [#allocation5], 256  }
0x18a6   :  { %2118 = vsyncadd [#allocation5], 4294967040 }
0x18a7   :  { %1661 = vsyncpa [#allocation3], 1 }
0x18a8   :  { %1662 = vsyncpa [#allocation5], 1 }

</bundles_post_ra>
